<compile_context>
chip_gen: v7x
topology: tpu7x:2x2x1
jax: 0.10.0
libtpu: 0.0.40
codegen_flags: <defaults>
</compile_context>

<pallas_src>
import functools
import math

import jax
import jax.numpy as jnp
from jax.experimental import pallas as pl
from jax.experimental.pallas import tpu as pltpu

_EPS = 1e-5


# ---------------------------------------------------------------------------
# Chip-generation detection, VMEM budget, compiler params
# ---------------------------------------------------------------------------
def _chip_gen():
    try:
        kind = jax.devices()[0].device_kind.lower()
    except Exception:
        return "v6"
    if "v5" in kind:
        return "v5"
    if "v7" in kind:
        return "v7"
    return "v6"


_GEN = _chip_gen()


def _vmem_limit_bytes():
    cap = 128 * 1024 * 1024
    try:
        cap = int(pltpu.get_tpu_info().vmem_capacity_bytes)
    except Exception:
        pass
    if cap <= 64 * 1024 * 1024:
        # v7x: 64 MiB physical -> leave headroom for compiler scratch/spill
        return 40 * 1024 * 1024
    # v5e/v6e: 128 MiB physical -> allow big single-K blocks
    return min(96 * 1024 * 1024, (cap * 3) // 4)


_VMEM_LIMIT = _vmem_limit_bytes()


def _compiler_params(dimension_semantics):
    return pltpu.CompilerParams(
        dimension_semantics=dimension_semantics,
        vmem_limit_bytes=_VMEM_LIMIT,
    )


# ---------------------------------------------------------------------------
# Tile-size selection (generation aware)
# ---------------------------------------------------------------------------
def _pick_row_tile(m):
    """M tile: >=2 parallel steps when M is large; full (padded to 8) otherwise."""
    if m % 512 == 0 and m >= 1024:
        return 512, m
    if m % 256 == 0 and m >= 512:
        return 256, m
    if m % 128 == 0 and m >= 128:
        return 128, m
    mp = ((m + 7) // 8) * 8
    return mp, mp


def _pick_col_tile(nc):
    # v6e MXU is 256-wide; v5e is 128-wide; v7x wants >=2 N steps (2 TCs).
    pref = 256 if _GEN == "v6" else 128
    for t in (pref, 128):
        if nc % t == 0:
            return t
    return nc


def _pad_k(k):
    """Pad an odd reduction size (stem K=147) up to an MXU-aligned multiple."""
    if k <= 128 or k % 128 == 0:
        return k
    r = 128 if _GEN == "v5" else 256
    return ((k + r - 1) // r) * r


# ---------------------------------------------------------------------------
# Pallas kernels
# ---------------------------------------------------------------------------
def _gemm_kernel(a_ref, b_ref, bias_ref, o_ref, *, apply_relu):
    """Single-K-step GEMM: out = relu?(A @ B_scaled + bias). No scratch/phases."""
    out = jnp.dot(a_ref[...], b_ref[...], preferred_element_type=jnp.float32)
    out = out + bias_ref[...]
    if apply_relu:
        out = jnp.maximum(out, 0.0)
    o_ref[...] = out.astype(o_ref.dtype)


def _gemm_res_kernel(a_ref, b_ref, bias_ref, r_ref, o_ref, *, apply_relu):
    """Single-K-step GEMM with fused residual add."""
    out = jnp.dot(a_ref[...], b_ref[...], preferred_element_type=jnp.float32)
    out = out + bias_ref[...] + r_ref[...].astype(jnp.float32)
    if apply_relu:
        out = jnp.maximum(out, 0.0)
    o_ref[...] = out.astype(o_ref.dtype)


def _conv_tap_kernel(x_ref, w_ref, bias_ref, o_ref, *, taps, m_out, apply_relu):
    """3x3 conv as in-kernel per-tap accumulation.

    x_ref:    (P, L, Cin) bf16 flattened (phase-split) padded activation.
    w_ref:    (T, Cin, tn) bf16 per-tap weights (BN scale folded).
    bias_ref: (1, tn) f32.
    o_ref:    (m_out, tn).
    Each tap reads a contiguous row-slice of the VMEM-resident flat activation
    (static offsets), so no HBM im2col blow-up and no in-kernel reshapes.
    """
    p0, off0 = taps[0]
    acc = jnp.dot(x_ref[p0, off0:off0 + m_out, :], w_ref[0],
                  preferred_element_type=jnp.float32)
    for t in range(1, len(taps)):
        p, off = taps[t]
        acc = acc + jnp.dot(x_ref[p, off:off + m_out, :], w_ref[t],
                            preferred_element_type=jnp.float32)
    out = acc + bias_ref[...]
    if apply_relu:
        out = jnp.maximum(out, 0.0)
    o_ref[...] = out.astype(o_ref.dtype)


def _pool_tap_kernel(x_ref, o_ref, *, taps, m_out):
    """3x3/s2 max-pool using the same tap layout, max instead of dot."""
    p0, off0 = taps[0]
    acc = x_ref[p0, off0:off0 + m_out, :]
    for t in range(1, len(taps)):
        p, off = taps[t]
        acc = jnp.maximum(acc, x_ref[p, off:off + m_out, :])
    o_ref[...] = acc


def _avgpool_fc_kernel(x_ref, w_ref, b_ref, o_ref):
    """Global average pool fused with the final Linear layer, all in f32."""
    pooled = jnp.mean(x_ref[...].astype(jnp.float32), axis=1)        # (N, C)
    o_ref[...] = (jnp.dot(pooled, w_ref[...],
                          preferred_element_type=jnp.float32) + b_ref[...])


# ---------------------------------------------------------------------------
# GEMM wrapper (1x1 convs, stem im2col GEMM) - single K step
# ---------------------------------------------------------------------------
def gemm_bias_act(a, b, bias, residual, apply_relu, out_dtype):
    """a:(M,K), b:(K,Nc) (BN scale pre-folded), bias:(Nc,), residual:(M,Nc)|None."""
    m, k = a.shape
    _, nc = b.shape
    tm, mp = _pick_row_tile(m)
    tn = _pick_col_tile(nc)
    kp = _pad_k(k)

    a = a.astype(jnp.bfloat16)
    b = b.astype(jnp.bfloat16)
    if kp != k:
        a = jnp.pad(a, ((0, 0), (0, kp - k)))
        b = jnp.pad(b, ((0, kp - k), (0, 0)))
    if mp != m:
        a = jnp.pad(a, ((0, mp - m), (0, 0)))
    bias2d = bias.reshape(1, nc).astype(jnp.float32)

    grid = (mp // tm, nc // tn)
    in_specs = [
        pl.BlockSpec((tm, kp), lambda mi, nj: (mi, 0)),
        pl.BlockSpec((kp, tn), lambda mi, nj: (0, nj)),
        pl.BlockSpec((1, tn), lambda mi, nj: (0, nj)),
    ]
    args = [a, b, bias2d]

    if residual is None:
        kernel = functools.partial(_gemm_kernel, apply_relu=apply_relu)
    else:
        r = residual.astype(jnp.bfloat16)
        if mp != m:
            r = jnp.pad(r, ((0, mp - m), (0, 0)))
        in_specs.append(pl.BlockSpec((tm, tn), lambda mi, nj: (mi, nj)))
        args.append(r)
        kernel = functools.partial(_gemm_res_kernel, apply_relu=apply_relu)

    out = pl.pallas_call(
        kernel,
        out_shape=jax.ShapeDtypeStruct((mp, nc), out_dtype),
        grid=grid,
        in_specs=in_specs,
        out_specs=pl.BlockSpec((tm, tn), lambda mi, nj: (mi, nj)),
        compiler_params=_compiler_params(("parallel", "parallel")),
    )(*args)
    return out[:m] if mp != m else out


# ---------------------------------------------------------------------------
# Window (tap) layout helper: pad, (phase-split for stride 2), flatten
# ---------------------------------------------------------------------------
def _window_phases(x, k, stride, pad, pad_value):
    """Returns (flat (P, L, C), taps ((phase, row_off),...), m_out, (hh,wh), (ho,wo)).

    For output row q = n*hh*wh + h*wh + w (junk rows with h>=ho or w>=wo are
    computed and discarded), tap (i,j) reads flat[phase][q + row_off]."""
    n, h, w, c = x.shape
    ho = (h + 2 * pad - k) // stride + 1
    wo = (w + 2 * pad - k) // stride + 1
    xp = jnp.pad(x, ((0, 0), (pad, pad), (pad, pad), (0, 0)),
                 constant_values=pad_value)
    hp, wp = xp.shape[1], xp.shape[2]
    if stride == 1:
        hh, wh = hp, wp
        phases = xp[None]                                   # (1, N, Hp, Wp, C)
    else:
        assert stride == 2
        if hp % 2 or wp % 2:
            xp = jnp.pad(xp, ((0, 0), (0, hp % 2), (0, wp % 2), (0, 0)),
                         constant_values=pad_value)
            hp, wp = xp.shape[1], xp.shape[2]
        hh, wh = hp // 2, wp // 2
        phases = jnp.stack([xp[:, pi::2, pj::2, :]
                            for pi in range(2) for pj in range(2)], axis=0)
    m_out = n * hh * wh
    taps = tuple(((i % stride) * stride + (j % stride),
                  (i // stride) * wh + (j // stride))
                 for i in range(k) for j in range(k))
    max_off = max(off for _, off in taps)
    l_tot = ((m_out + max_off + 7) // 8) * 8
    flat = phases.reshape(phases.shape[0], m_out, c)
    flat = jnp.pad(flat, ((0, 0), (0, l_tot - m_out), (0, 0)),
                   constant_values=pad_value)
    return flat, taps, m_out, (hh, wh), (ho, wo)


# ---------------------------------------------------------------------------
# Conv / pool / head wrappers
# ---------------------------------------------------------------------------
def _fold_bn(bn, cout):
    gamma, beta, mean, var = bn
    scale = gamma / jnp.sqrt(var + _EPS)
    bias = beta - mean * scale
    return scale, bias


def conv1x1_bn(x, w, bn, stride=1, apply_relu=True, residual=None):
    """1x1 Conv(bias=False) + BN (+residual) (+ReLU) as a single-K Pallas GEMM."""
    if stride > 1:
        x = x[:, ::stride, ::stride, :]
    n, h, wd, cin = x.shape
    cout = w.shape[3]
    scale, bias = _fold_bn(bn, cout)
    b = w.reshape(cin, cout) * scale[None, :]
    a = x.reshape(n * h * wd, cin)
    res = None if residual is None else residual.reshape(n * h * wd, cout)
    out = gemm_bias_act(a, b, bias, res, apply_relu, jnp.bfloat16)
    return out.reshape(n, h, wd, cout)


def conv3x3_bn(x, w, bn, stride=1, apply_relu=True):
    """3x3 Conv(pad=1, bias=False) + BN (+ReLU), in-kernel per-tap accumulation."""
    n = x.shape[0]
    cin, cout = w.shape[2], w.shape[3]
    scale, bias = _fold_bn(bn, cout)
    wtap = (w * scale[None, None, None, :]).reshape(9, cin, cout).astype(jnp.bfloat16)
    bias2d = bias.reshape(1, cout).astype(jnp.float32)

    flat, taps, m_out, (hh, wh), (ho, wo) = _window_phases(
        x.astype(jnp.bfloat16), 3, stride, 1, pad_value=0.0)
    nphase, l_tot, _ = flat.shape

    tn = _pick_col_tile(cout)
    kernel = functools.partial(_conv_tap_kernel, taps=taps, m_out=m_out,
                               apply_relu=apply_relu)
    out = pl.pallas_call(
        kernel,
        out_shape=jax.ShapeDtypeStruct((m_out, cout), jnp.bfloat16),
        grid=(cout // tn,),
        in_specs=[
            pl.BlockSpec((nphase, l_tot, cin), lambda nj: (0, 0, 0)),
            pl.BlockSpec((9, cin, tn), lambda nj: (0, 0, nj)),
            pl.BlockSpec((1, tn), lambda nj: (0, nj)),
        ],
        out_specs=pl.BlockSpec((m_out, tn), lambda nj: (0, nj)),
        compiler_params=_compiler_params(("parallel",)),
    )(flat, wtap, bias2d)
    return out.reshape(n, hh, wh, cout)[:, :ho, :wo, :]


def _im2col(x, kh, kw, stride, pad):
    """x: (N,H,W,C) -> patch matrix (N*Ho*Wo, kh*kw*C). Stem (Cin=3) only."""
    n, h, w, c = x.shape
    ho = (h + 2 * pad - kh) // stride + 1
    wo = (w + 2 * pad - kw) // stride + 1
    xp = jnp.pad(x, ((0, 0), (pad, pad), (pad, pad), (0, 0)))
    cols = []
    for i in range(kh):
        for j in range(kw):
            cols.append(
                xp[:, i:i + (ho - 1) * stride + 1:stride,
                      j:j + (wo - 1) * stride + 1:stride, :])
    patches = jnp.stack(cols, axis=3)        # ordering matches HWIO flatten
    return patches.reshape(n * ho * wo, kh * kw * c), ho, wo


def conv_stem_bn_relu(x, w, bn):
    """7x7/s2/p3 stem conv + BN + ReLU (im2col GEMM, K padded 147->256)."""
    kh, kw, cin, cout = w.shape
    n = x.shape[0]
    a, ho, wo = _im2col(x.astype(jnp.bfloat16), kh, kw, 2, 3)
    scale, bias = _fold_bn(bn, cout)
    b = w.reshape(kh * kw * cin, cout) * scale[None, :]
    out = gemm_bias_act(a, b, bias, None, True, jnp.bfloat16)
    return out.reshape(n, ho, wo, cout)


def maxpool_3x3_s2_p1(x):
    """nn.MaxPool2d(kernel_size=3, stride=2, padding=1) on NHWC."""
    n, h, w, c = x.shape
    pad_val = float(jnp.finfo(x.dtype).min)
    flat, taps, m_out, (hh, wh), (ho, wo) = _window_phases(
        x, 3, 2, 1, pad_value=pad_val)
    nphase, l_tot, _ = flat.shape
    out = pl.pallas_call(
        functools.partial(_pool_tap_kernel, taps=taps, m_out=m_out),
        out_shape=jax.ShapeDtypeStruct((m_out, c), x.dtype),
        grid=(1,),
        in_specs=[pl.BlockSpec((nphase, l_tot, c), lambda i: (0, 0, 0))],
        out_specs=pl.BlockSpec((m_out, c), lambda i: (0, 0)),
        compiler_params=_compiler_params(("arbitrary",)),
    )(flat)
    return out.reshape(n, hh, wh, c)[:, :ho, :wo, :]


def avgpool_fc(x, fc_w, fc_b):
    """AdaptiveAvgPool2d((1,1)) + flatten + Linear, fused, f32 (N, classes)."""
    n, h, w, c = x.shape
    nclass = fc_w.shape[1]
    xr = x.reshape(n, h * w, c)
    return pl.pallas_call(
        _avgpool_fc_kernel,
        out_shape=jax.ShapeDtypeStruct((n, nclass), jnp.float32),
        grid=(1,),
        in_specs=[
            pl.BlockSpec((n, h * w, c), lambda i: (0, 0, 0)),
            pl.BlockSpec((c, nclass), lambda i: (0, 0)),
            pl.BlockSpec((1, nclass), lambda i: (0, 0)),
        ],
        out_specs=pl.BlockSpec((n, nclass), lambda i: (0, 0)),
        compiler_params=_compiler_params(("arbitrary",)),
    )(xr, fc_w.astype(jnp.float32), fc_b.reshape(1, nclass).astype(jnp.float32))


# ---------------------------------------------------------------------------
# Parameter construction (deterministic, mirrors the PyTorch __init__ shapes)
# ---------------------------------------------------------------------------
def _conv_weight(key, kh, kw, cin, cout):
    # kaiming_normal_(mode='fan_out', nonlinearity='relu')
    std = math.sqrt(2.0 / (kh * kw * cout))
    return std * jax.random.normal(key, (kh, kw, cin, cout), jnp.float32)


def _bn_params(c):
    # PyTorch BatchNorm2d defaults: gamma=1, beta=0, running_mean=0, running_var=1
    return (jnp.ones((c,), jnp.float32), jnp.zeros((c,), jnp.float32),
            jnp.zeros((c,), jnp.float32), jnp.ones((c,), jnp.float32))


def _make_bottleneck_params(key, in_c, channel, stride):
    # torchvision-style Bottleneck, expansion = 4, stride on the 3x3 conv
    k1, k2, k3, k4 = jax.random.split(key, 4)
    p = {
        "conv1": _conv_weight(k1, 1, 1, in_c, channel),        "bn1": _bn_params(channel),
        "conv2": _conv_weight(k2, 3, 3, channel, channel),     "bn2": _bn_params(channel),
        "conv3": _conv_weight(k3, 1, 1, channel, channel * 4), "bn3": _bn_params(channel * 4),
        "stride": stride,
    }
    if stride != 1 or in_c != channel * 4:
        p["downsample"] = (_conv_weight(k4, 1, 1, in_c, channel * 4),
                           _bn_params(channel * 4))
    return p


def make_resnet_params(key, blocks_num, num_classes):
    keys = jax.random.split(key, 6)
    params = {"conv1": _conv_weight(keys[0], 7, 7, 3, 64), "bn1": _bn_params(64)}
    in_c = 64
    for li, (channel, nblk, stride) in enumerate(
            zip([64, 128, 256, 512], blocks_num, [1, 2, 2, 2])):
        layer = []
        lkeys = jax.random.split(keys[1 + li], nblk)
        for bi in range(nblk):
            s = stride if bi == 0 else 1
            layer.append(_make_bottleneck_params(lkeys[bi], in_c, channel, s))
            in_c = channel * 4
        params[f"layer{li + 1}"] = layer
    params["fc_w"] = 0.01 * jax.random.normal(keys[5], (in_c, num_classes), jnp.float32)
    params["fc_b"] = jnp.zeros((num_classes,), jnp.float32)
    return params


# ---------------------------------------------------------------------------
# Forward pass
# ---------------------------------------------------------------------------
def _bottleneck_forward(x, p):
    s = p["stride"]
    if "downsample" in p:
        dw, dbn = p["downsample"]
        identity = conv1x1_bn(x, dw, dbn, stride=s, apply_relu=False)
    else:
        identity = x
    out = conv1x1_bn(x, p["conv1"], p["bn1"], stride=1, apply_relu=True)
    out = conv3x3_bn(out, p["conv2"], p["bn2"], stride=s, apply_relu=True)
    # final 1x1 conv: fuse BN + residual add + ReLU in the Pallas GEMM kernel
    out = conv1x1_bn(out, p["conv3"], p["bn3"], stride=1,
                     apply_relu=True, residual=identity)
    return out


def resnet_forward(params, x_nchw):
    # layout: accept NCHW (PyTorch convention), compute in NHWC bf16
    x = jnp.transpose(x_nchw, (0, 2, 3, 1)).astype(jnp.bfloat16)
    x = conv_stem_bn_relu(x, params["conv1"], params["bn1"])
    x = maxpool_3x3_s2_p1(x)
    for li in range(1, 5):
        for blk in params[f"layer{li}"]:
            x = _bottleneck_forward(x, blk)
    logits = avgpool_fc(x, params["fc_w"], params["fc_b"])   # (N, num_classes) f32
    return logits


# ---------------------------------------------------------------------------
if __name__ == "__main__":
    key = jax.random.PRNGKey(0)
    k_param, k_input = jax.random.split(key)

    blocks_num = [1, 1, 1, 1]     # small Bottleneck ResNet (expansion=4)
    num_classes = 10
    params = make_resnet_params(k_param, blocks_num, num_classes)

    x = jax.random.normal(k_input, (2, 3, 64, 64), jnp.float32)  # NCHW input

    logits = resnet_forward(params, x)
    logits = jax.block_until_ready(logits)

    assert logits.shape == (2, num_classes), logits.shape
    assert bool(jnp.all(jnp.isfinite(logits)))
    print("KERNEL_OK")
</pallas_src>

<mosaic_0001>
module attributes {stable_mosaic.version = 11 : i64} {
  func.func @_gemm_kernel(%arg0: i32, %arg1: i32, %arg2: memref<512x256xbf16, #tpu.memory_space<vmem>>, %arg3: memref<256x64xbf16, #tpu.memory_space<vmem>>, %arg4: memref<1x64xf32, #tpu.memory_space<vmem>>, %arg5: memref<512x64xbf16, #tpu.memory_space<vmem>>) attributes {dimension_semantics = [#tpu.dimension_semantics<parallel>, #tpu.dimension_semantics<parallel>], iteration_bounds = array<i64: 4, 1>, scalar_prefetch = 0 : i64, scratch_operands = 0 : i64, tpu.core_type = #tpu.core_type<tc>, window_params = [{transform_indices = @transform_0, window_bounds = array<i64: 512, 256>}, {transform_indices = @transform_1, window_bounds = array<i64: 256, 64>}, {transform_indices = @transform_2, window_bounds = array<i64: 1, 64>}, {transform_indices = @transform_3, window_bounds = array<i64: 512, 64>}]} {
    %c0 = arith.constant 0 : index
    %c0_0 = arith.constant 0 : index
    %0 = vector.load %arg2[%c0, %c0_0] : memref<512x256xbf16, #tpu.memory_space<vmem>>, vector<512x256xbf16>
    %c0_1 = arith.constant 0 : index
    %c0_2 = arith.constant 0 : index
    %1 = vector.load %arg3[%c0_1, %c0_2] : memref<256x64xbf16, #tpu.memory_space<vmem>>, vector<256x64xbf16>
    %cst = arith.constant dense<0.000000e+00> : vector<512x64xf32>
    %2 = tpu.matmul %0, %1, %cst {dimension_numbers = #tpu.dot_dimension_numbers<[1], [0], [0], [1], [0, 0, 1, 1], [], []>} : vector<512x256xbf16>, vector<256x64xbf16>, vector<512x64xf32> -> vector<512x64xf32>
    %c0_3 = arith.constant 0 : index
    %c0_4 = arith.constant 0 : index
    %3 = vector.load %arg4[%c0_3, %c0_4] : memref<1x64xf32, #tpu.memory_space<vmem>>, vector<1x64xf32>
    %4 = vector.broadcast %3 : vector<1x64xf32> to vector<512x64xf32>
    %5 = arith.addf %2, %4 : vector<512x64xf32>
    %cst_5 = arith.constant 0.000000e+00 : f32
    %6 = vector.broadcast %cst_5 : f32 to vector<512x64xf32>
    %7 = arith.maximumf %5, %6 : vector<512x64xf32>
    %8 = arith.truncf %7 : vector<512x64xf32> to vector<512x64xbf16>
    %c0_6 = arith.constant 0 : index
    %c0_7 = arith.constant 0 : index
    %9 = vector.load %arg5[%c0_6, %c0_7] : memref<512x64xbf16, #tpu.memory_space<vmem>>, vector<512x64xbf16>
    tpu.vector_store %arg5[%c0_6, %c0_7], %8 {strides = array<i32>} : memref<512x64xbf16, #tpu.memory_space<vmem>>, vector<512x64xbf16>,
    return
  }
  func.func @transform_0(%arg0: i32, %arg1: i32) -> (i32, i32) {
    %c0_i32 = arith.constant 0 : i32
    %c0_i32_0 = arith.constant 0 : i32
    return %arg0, %c0_i32 : i32, i32
  }
  func.func @transform_1(%arg0: i32, %arg1: i32) -> (i32, i32) {
    %c0_i32 = arith.constant 0 : i32
    %c0_i32_0 = arith.constant 0 : i32
    return %c0_i32, %arg1 : i32, i32
  }
  func.func @transform_2(%arg0: i32, %arg1: i32) -> (i32, i32) {
    %c0_i32 = arith.constant 0 : i32
    %c0_i32_0 = arith.constant 0 : i32
    return %c0_i32, %arg1 : i32, i32
  }
  func.func @transform_3(%arg0: i32, %arg1: i32) -> (i32, i32) {
    %c0_i32 = arith.constant 0 : i32
    return %arg0, %arg1 : i32, i32
  }
}

</mosaic_0001>

<bundles_post_ra>
// kernel: tpu_custom_call.1
= control target key start
LH: loop header
LB: loop body
LE: loop exit
PB: predicated region body
PF: predicated region fallthrough
CT: control target
= control target key end

     0   :  { %8 = vsyncpa [#allocation3], 0  ;;  %s2776_s0 = inlined_call_operand.hbm [shape: bf16[2048,256], index: 0, kind: input, shape index: {}]   ;;  %s2777_s1 = inlined_call_operand.hbm [shape: bf16[256,64], index: 1, kind: input, shape index: {}]   ;;  %s2778_s2 = inlined_call_operand.hbm [shape: f32[1,64], index: 2, kind: input, shape index: {}]   ;;  %s2779_s3 = inlined_call_operand.hbm [shape: bf16[2048,64], index: 3, kind: output, shape index: {}]  }
   0x1   :  { %10 = vsyncpa [#allocation3 + $0x1], 0 }
   0x2   :  { %11 = vsyncpa [#allocation6], 0 }
   0x3   :  { %12 = vsyncpa [#allocation4], 0 }
   0x4   :  { %14 = vsyncpa [#allocation4 + $0x1], 0  ;;  %s2233_s12 = smov 0   ;;  %s2235_s13 = smov 0  }
   0x5   :  { %s2237_s14 = smov 0   ;;  %s2239_s15 = smov 0  }
   0x6   :  { %s2241_s16 = smov 0   ;;  %s2243_s17 = smov 0  }
   0x7 LB: > { %s1562_s18 = sadd.s32 4294967295, %s2200_s17   ;;  %s1563_s19 = sadd.s32 4294967294, %s2200_s17   ;;  %s2200_s17 = sphi %s2243_s17, %s20_s17   ;;  %s2196_s16 = sphi %s2241_s16, %s2801_s16   ;;  %s2192_s15 = sphi %s2239_s15, %s2800_s15   ;;  %s2188_s14 = sphi %s2237_s14, %s2799_s14   ;;  %s2184_s13 = sphi %s2235_s13, %s2798_s13   ;;  %s2180_s12 = sphi %s2233_s12, %s2797_s12  }
   0x8   : > { %p52_p0 = scmp.ne.s32.totalorder %s2184_s13, %s2180_s12  ;;  %p2267_p1 = scmp.eq.s32.totalorder %s1562_s18, 0 }
   0x9   : > { %p2271_p2 = scmp.eq.s32.totalorder %s1562_s18, 3  ;;  %p136_p3 = scmp.eq.s32.totalorder %s1563_s19, 3 }
   0xa   : > { %s2784_s20 = scalar_select %p2267_p1, 1, 0 }
   0xb   : > { %s2785_s21 = scalar_select %p2271_p2, 1, 0 }
   0xc   : > { %p2277_p4 = por %p2267_p1, %p52_p0  ;;  %p1564_p5 = scmp.ge.s32.totalorder %s2200_s17, 1 }
   0xd   : > { %p2282_p6 = por %p136_p3, %p52_p0  ;;  %p143_p7 = scmp.lt.s32.totalorder %s2200_s17, 5 }
   0xe   : > { %s2786_s22 = scalar_select %p2277_p4, 1, 0 }
   0xf   : > { %s2787_s23 = scalar_select %p2282_p6, 1, 0 }
  0x10   : > { %p2287_p8 = pnand %p1564_p5, %p143_p7  ;;  %s2202_s25 = smov [#allocation5]  }
  0x11   : > { %s157_s26 = sshll.u32 %s2202_s25, 4  ;;  %s2203_s28 = smov [#allocation7]   ;;  %s158_s26 = int_to_ptr.vmem [resolvable:$true] %s157_s26 }
  0x12   : > { %s2788_s24 = scalar_select %p2287_p8, 1, 0 }
  0x13   : > { %p1838_p9 = pneg %p2287_p8  ;;  %s173_s29 = sshll.u32 %s2203_s28, 4  ;;  %s2299_s29 = int_to_ptr.vmem [resolvable:$true] %s173_s29 }
  0x14   : > { %s2028_s5 = scalar_lea.hbm %s2777_s1, 2048 }
  0x15   : > { %p2295_p10 = pnand %p1838_p9, %p2267_p1  ;;  %p2029_p11 = scmp.ne.s32.totalorder %s2777_s1, %s2028_s5 }
  0x16   : > { %p2035_p3 = scmp.lt.u32.totalorder %s2028_s5, %s2777_s1 }
  0x17   : > { %p2030_p12 = pneg %p2295_p10 }
  0x19   : > { %p2031_p13 = pnand %p2030_p12, %p2029_p11 }
  0x1b   : > { %p2032_p0 = pneg %p2031_p13 }
  0x1d   : > { %p2037_p5 = pnand %p2035_p3, %p2032_p0 }
  0x1f   : > { %2040 = shalt.err (!%p2037_p5)
}
  0x20   : > { %s2041_s10 = scalar_lea.vmem %s158_s26, 2048  ;;  %p2049_p1 = scmp.lt.s32.totalorder %s158_s26, %s158_s26 }
  0x21   : > { %p2042_p7 = scmp.ne.s32.totalorder %s158_s26, %s2041_s10  ;;  %p2050_p4 = scmp.lt.s32.totalorder %s2041_s10, %s2041_s10 }
  0x23   : > { %p2044_p9 = pnand %p2042_p7, %p2030_p12  ;;  %p2051_p8 = por %p2050_p4, %p2049_p1 }
  0x25   : > { %p2045_p6 = pneg %p2044_p9 }
  0x27   : > { %p2052_p2 = pnand %p2051_p8, %p2045_p6 }
  0x29   : > { %2055 = shalt.err (!%p2052_p2)
}
  0x2a   : > { %s2204_s11 = smov 64   ;;  %s2205_s18 = smov 4  }
  0x2b   : > { %1841 = dma.hbm_to_vmem [thread:$0]  (!%p2295_p10), %s2777_s1, 2048, %s158_s26, [#allocation6], %s2204_s11, %s2204_s11, %s2205_s18  }
  0x2c   : > { %s2056_s4 = scalar_lea.hbm %s2778_s2, 16 }
  0x2d   : > { %p2057_p11 = scmp.ne.s32.totalorder %s2778_s2, %s2056_s4  ;;  %p2063_p4 = scmp.lt.u32.totalorder %s2056_s4, %s2778_s2 }
  0x2f   : > { %p2059_p1 = pnand %p2057_p11, %p2030_p12 }
  0x31   : > { %p2060_p2 = pneg %p2059_p1 }
  0x33   : > { %p2065_p6 = pnand %p2063_p4, %p2060_p2 }
  0x35   : > { %2068 = shalt.err (!%p2065_p6)
}
  0x36   : > { %s2069_s26 = scalar_lea.vmem %s2299_s29, 16  ;;  %s2076_s9 = scalar_lea.vmem %s2299_s29, 32 }
  0x37   : > { %p2070_p8 = scmp.ne.s32.totalorder %s2299_s29, %s2069_s26  ;;  %p2077_p3 = scmp.lt.s32.totalorder %s2299_s29, %s2299_s29 }
  0x38   : > { %p2078_p5 = scmp.lt.s32.totalorder %s2076_s9, %s2069_s26 }
  0x39   : > { %p2072_p13 = pnand %p2070_p8, %p2030_p12 }
  0x3a   : > { %p2079_p7 = por %p2078_p5, %p2077_p3 }
  0x3b   : > { %p2073_p0 = pneg %p2072_p13 }
  0x3d   : > { %p2080_p9 = pnand %p2079_p7, %p2073_p0 }
  0x3f   : > { %2083 = shalt.err (!%p2080_p9)
}
  0x40   : > { %1844 = dma.hbm_to_vmem [thread:$0]  (!%p2295_p10), %s2778_s2, 16, %s2299_s29, [#allocation6]  }
  0x41   : > { %s32_s18 = sadd.s32 1, %s2196_s16  ;;  %s39_s19 = sadd.s32 1, %s2188_s14 }
  0x42   : > { %p34_p12 = scmp.ge.s32.totalorder %s32_s18, 4  ;;  %p46_p11 = scmp.ne.s32.totalorder %s2188_s14, %s2184_s13 }
  0x43   : > { %p47_p1 = scmp.eq.s32.totalorder %s2200_s17, 0  ;;  %p1855_p2 = scmp.lt.s32.totalorder %s2200_s17, 4 }
  0x44   : > { %s2803_s18 = smov (%p34_p12, %s32_s18), 0  ;;  %p2790_p6 = scmp.ne.s32.totalorder %s2785_s21, 0 }
  0x45   : > { %p48_p4 = por %p47_p1, %p46_p11  ;;  %s36_s25 = ssub.s32 %s2196_s16, %s2803_s18 }
  0x46   : > { %p2359_p8 = por %p2790_p6, %p46_p11  ;;  %s184_s28 = sand.u32 1, %s2188_s14  }
  0x47   : > { %p37_p13 = scmp.eq.s32.totalorder %s36_s25, 0  ;;  %s1568_s29 = sshll.u32 %s184_s28, 9 }
  0x48   : > { %s1728_s30 = sshll.u32 %s2196_s16, 13  ;;  %s188_s21 = scalar_lea.vmem [#allocation2], %s1568_s29 }
  0x49   : > { %s2368_s4 = scalar_select %p37_p13, %s2188_s14, %s39_s19  }
  0x4a   : > { %s2373_s7 = scalar_lea.hbm %s2776_s0, %s1728_s30  ;;  %s196_s8 = sshll.u32 %s188_s21, 4  ;;  %s2381_s8 = int_to_ptr.vmem [resolvable:$true] %s196_s8 }
  0x4b   : > { %p2377_p10 = pnand %p1855_p2, %p48_p4  ;;  %s2383_s9 = scalar_lea.sflag [#allocation3], %s184_s28 }
  0x4c   : > { %s2084_s10 = scalar_lea.hbm %s2373_s7, 8192  ;;  %s2089_s25 = scalar_lea.hbm %s2776_s0, 32768 }
  0x4d   : > { %p2085_p0 = scmp.ne.s32.totalorder %s2373_s7, %s2084_s10  ;;  %p2086_p3 = pneg %p2377_p10 }
  0x4e   : > { %p2090_p9 = scmp.lt.u32.totalorder %s2373_s7, %s2776_s0  ;;  %p2091_p12 = scmp.lt.u32.totalorder %s2089_s25, %s2084_s10 }
  0x4f   : > { %p2087_p5 = pnand %p2086_p3, %p2085_p0  ;;  %p2093_p1 = scmp.lt.u32.totalorder %s2084_s10, %s2373_s7 }
  0x50   : > { %p2092_p11 = por %p2091_p12, %p2090_p9 }
  0x51   : > { %p2088_p7 = pneg %p2087_p5 }
  0x52   : > { %p2094_p2 = por %p2093_p1, %p2092_p11 }
  0x54   : > { %p2095_p4 = pnand %p2094_p2, %p2088_p7 }
  0x56   : > { %2098 = shalt.err (!%p2095_p4)
}
  0x57   : > { %s2099_s28 = scalar_lea.vmem %s2381_s8, 8192  ;;  %s2206_s5 = smov [#allocation2]  }
  0x58   : > { %p2100_p6 = scmp.ne.s32.totalorder %s2381_s8, %s2099_s28  ;;  %s2104_s6 = sshll.u32 %s2206_s5, 4  ;;  %s2105_s6 = int_to_ptr.vmem [resolvable:$false] %s2104_s6 }
  0x59   : > { %s2106_s21 = scalar_lea.vmem %s2105_s6, 16384  ;;  %p2107_p5 = scmp.lt.s32.totalorder %s2381_s8, %s2105_s6 }
  0x5a   : > { %p2102_p13 = pnand %p2100_p6, %p2086_p3  ;;  %p2108_p9 = scmp.lt.s32.totalorder %s2106_s21, %s2099_s28 }
  0x5c   : > { %p2103_p0 = pneg %p2102_p13  ;;  %p2109_p12 = por %p2108_p9, %p2107_p5 }
  0x5e   : > { %p2110_p11 = pnand %p2109_p12, %p2103_p0 }
  0x60   : > { %2113 = shalt.err (!%p2110_p11)
}
  0x61   : > { %s2207_s10 = smov 128   ;;  %s2208_s11 = smov 8  }
  0x62   : > { %1848 = dma.hbm_to_vmem [thread:$0]  (!%p2377_p10), %s2373_s7, 8192, %s2381_s8, %s2383_s9, %s2207_s10, %s2207_s10, %s2208_s11  }
  0x63   : > { %p2793_p3 = scmp.ne.s32.totalorder %s2788_s24, 0 }
  0x64   : > { %s2414_s19 = sand.u32 (!%p2793_p3), 1, %s2184_s13   ;;  %p2794_p7 = scmp.ne.s32.totalorder (!%p2793_p3), %s2786_s22, 0 }
  0x65   : > { %208 = sbr.rel (%p2793_p3) target bundleno = 532 (0x214), region = 32  ;;  %s1573_s25 = sshll.u32 (!%p2793_p3), %s2414_s19, 9 }
  0x66   : > { %s211_s29 = scalar_lea.sflag (!%p2793_p3), [#allocation3], %s2414_s19  ;;  %s2418_s30 = scalar_lea.vmem (!%p2793_p3), [#allocation2], %s1573_s25 }
  0x6c   : > { %2167 = dma.done.wait (%p2794_p7), %s211_s29, 8192  }
  0x6d   : > { %2169 = vsyncadd (%p2794_p7), %s211_s29, 4294959104  ;;  %p2795_p10 = scmp.ne.s32.totalorder %s2784_s20, 0 }
  0x6f   : > { %2171 = dma.done.wait (%p2795_p10), [#allocation6], 2064  }
  0x70   : > { %2173 = vsyncadd (%p2795_p10), [#allocation6], 4294965232  ;;  %v2209_v0 = vmov 0   ;;  %v1916_v1 = vld [vmem:[#allocation5] sm:$0xff]   ;;  %v1917_v2 = vld [vmem:[#allocation5 + $0x8] sm:$0xff]   ;;  %s1576_s20 = sshll.u32 %s2414_s19, 8 }
  0x71   : > { %767 = vmatprep.subr.bf16.mxu0 %v2209_v0  ;;  %1794 = vmatprep.subr.bf16.mxu1 %v2209_v0  ;;  %v1918_v3 = vld [vmem:[#allocation5 + $0x10] sm:$0xff]   ;;  %v1919_v4 = vld [vmem:[#allocation5 + $0x18] sm:$0xff]   ;;  %v1920_v5 = vld [vmem:[#allocation5 + $0x20] sm:$0xff]   ;;  %vm1376_vm0 = vcmask 519168   ;;  %s2531_s22 = scalar_lea.vmem [#allocation8], %s1576_s20  ;;  %s1793_s24 = sshll.u32 %s2192_s15, 12 }
  0x72   : > { %768 = vmatpush1.bf16.msra.mxu0 %v1916_v1  ;;  %1810 = vmatpush1.bf16.msra.mxu1 %v1916_v1  ;;  %v1934_v6 = vld [vmem:[%s2418_s30 + $0x4] ss:$8 sps:$4 sm:$0xff]   ;;  %v1922_v9 = vld [vmem:[#allocation5 + $0x30] sm:$0xff]   ;;  %v1923_v10 = vld [vmem:[#allocation5 + $0x38] sm:$0xff]   ;;  %s1456_s7 = sshll.u32 %s2531_s22, 4  ;;  %s2718_s9 = scalar_lea.hbm %s2779_s3, %s1793_s24  ;;  %s2720_s7 = int_to_ptr.vmem [resolvable:$true] %s1456_s7 }
  0x73   : > { %769 = vmatprep.subr.bf16.mxu0 %v2209_v0  ;;  %1795 = vmatprep.subr.bf16.mxu1 %v2209_v0  ;;  %v1921_v7 = vld [vmem:[#allocation5 + $0x28] sm:$0xff]   ;;  %v1924_v11 = vld [vmem:[#allocation5 + $0x40] sm:$0xff]   ;;  %v1926_v13 = vld [vmem:[#allocation5 + $0x50] sm:$0xff]   ;;  %s1442_s15 = scalar_lea.sflag [#allocation4], %s2414_s19  ;;  %s2114_s28 = scalar_lea.vmem %s2720_s7, 4096 }
  0x74   : > { %v1937_v8 = vld [vmem:[%s2418_s30 + $0x104] ss:$8 sps:$4 sm:$0xff]   ;;  %799 = vmatprep.mubr.bf16.mxu0 %v1934_v6  ;;  %v1927_v14 = vld [vmem:[#allocation5 + $0x58] sm:$0xff]   ;;  %v1930_v17 = vld [vmem:[#allocation5 + $0x70] sm:$0xff]   ;;  %p2115_p1 = scmp.ne.s32.totalorder %s2720_s7, %s2114_s28  ;;  %s2210_s5 = smov [#allocation8]  }
  0x75   : > { %927 = vmatprep.mubr.bf16.mxu1 %v1937_v8  ;;  %v1925_v12 = vld [vmem:[#allocation5 + $0x48] sm:$0xff]   ;;  %v1928_v15 = vld [vmem:[#allocation5 + $0x60] sm:$0xff]   ;;  %v1931_v18 = vld [vmem:[#allocation5 + $0x78] sm:$0xff]   ;;  %s2118_s6 = sshll.u32 %s2210_s5, 4  ;;  %s2119_s6 = int_to_ptr.vmem [resolvable:$false] %s2118_s6 }
  0x76   : > { %770 = vmatpush1.bf16.msra.mxu0 %v1917_v2  ;;  %1811 = vmatpush1.bf16.msra.mxu1 %v1917_v2  ;;  %v1929_v16 = vld [vmem:[#allocation5 + $0x68] sm:$0xff]   ;;  %v1938_v21 = vld [vmem:[%s2418_s30 + $0x14] ss:$8 sps:$4 sm:$0xff]   ;;  %v1942_v23 = vld [vmem:[%s2418_s30 + $0x10] ss:$8 sps:$4 sm:$0xff]   ;;  %p2116_p2 = pnand %p2115_p1, %p2359_p8  ;;  %s2120_s21 = scalar_lea.vmem %s2119_s6, 8192 }
  0x77   : > { %771 = vmatprep.subr.bf16.mxu0 %v2209_v0  ;;  %1796 = vmatprep.subr.bf16.mxu1 %v2209_v0  ;;  %v1932_v19 = vld [vmem:[%s2418_s30] ss:$8 sps:$4 sm:$0xff]   ;;  %v1940_v22 = vld [vmem:[%s2418_s30 + $0x114] ss:$8 sps:$4 sm:$0xff]   ;;  %v1943_v24 = vld [vmem:[%s2418_s30 + $0x110] ss:$8 sps:$4 sm:$0xff]   ;;  %p2121_p6 = scmp.lt.s32.totalorder %s2720_s7, %s2119_s6  ;;  %p2122_p13 = scmp.lt.s32.totalorder %s2120_s21, %s2114_s28 }
  0x78   : > { %v1935_v20 = vld [vmem:[%s2418_s30 + $0x100] ss:$8 sps:$4 sm:$0xff]   ;;  %v1944_v25 = vld [vmem:[%s2418_s30 + $0x24] ss:$8 sps:$4 sm:$0xff]   ;;  %v1950_v29 = vld [vmem:[%s2418_s30 + $0x34] ss:$8 sps:$4 sm:$0xff]   ;;  %p2117_p4 = pneg %p2116_p2 }
  0x79   : > { %v1946_v26 = vld [vmem:[%s2418_s30 + $0x124] ss:$8 sps:$4 sm:$0xff]   ;;  %v1948_v27 = vld [vmem:[%s2418_s30 + $0x20] ss:$8 sps:$4 sm:$0xff]   ;;  %v1952_v30 = vld [vmem:[%s2418_s30 + $0x134] ss:$8 sps:$4 sm:$0xff]   ;;  %p2123_p0 = por %p2122_p13, %p2121_p6 }
  0x7a   : > { %772 = vmatpush1.bf16.msra.mxu0 %v1918_v3  ;;  %1812 = vmatpush1.bf16.msra.mxu1 %v1918_v3  ;;  %v1949_v28 = vld [vmem:[%s2418_s30 + $0x120] ss:$8 sps:$4 sm:$0xff]   ;;  %v1954_v31 = vld [vmem:[%s2418_s30 + $0x30] ss:$8 sps:$4 sm:$0xff]   ;;  %v1956_v33 = vld [vmem:[%s2418_s30 + $0x44] ss:$8 sps:$4 sm:$0xff]  }
  0x7b   : > { %773 = vmatprep.subr.bf16.mxu0 %v2209_v0  ;;  %1797 = vmatprep.subr.bf16.mxu1 %v2209_v0  ;;  %v1955_v32 = vld [vmem:[%s2418_s30 + $0x130] ss:$8 sps:$4 sm:$0xff]   ;;  %v1958_v34 = vld [vmem:[%s2418_s30 + $0x144] ss:$8 sps:$4 sm:$0xff]   ;;  %v1960_v35 = vld [vmem:[%s2418_s30 + $0x40] ss:$8 sps:$4 sm:$0xff]   ;;  %p2124_p5 = pnand %p2123_p0, %p2117_p4 }
  0x7c   : > { %v1961_v36 = vld [vmem:[%s2418_s30 + $0x140] ss:$8 sps:$4 sm:$0xff]   ;;  %v1962_v37 = vld [vmem:[%s2418_s30 + $0x54] ss:$8 sps:$4 sm:$0xff]   ;;  %v1966_v39 = vld [vmem:[%s2418_s30 + $0x50] ss:$8 sps:$4 sm:$0xff]  }
  0x7d   : > { %v1964_v38 = vld [vmem:[%s2418_s30 + $0x154] ss:$8 sps:$4 sm:$0xff]   ;;  %v1967_v40 = vld [vmem:[%s2418_s30 + $0x150] ss:$8 sps:$4 sm:$0xff]   ;;  %v1968_v41 = vld [vmem:[%s2418_s30 + $0x64] ss:$8 sps:$4 sm:$0xff]  }
  0x7e   : > { %774 = vmatpush1.bf16.msra.mxu0 %v1919_v4  ;;  %1813 = vmatpush1.bf16.msra.mxu1 %v1919_v4  ;;  %v1970_v42 = vld [vmem:[%s2418_s30 + $0x164] ss:$8 sps:$4 sm:$0xff]   ;;  %v1972_v43 = vld [vmem:[%s2418_s30 + $0x60] ss:$8 sps:$4 sm:$0xff]   ;;  %v1974_v45 = vld [vmem:[%s2418_s30 + $0x74] ss:$8 sps:$4 sm:$0xff]  }
  0x7f   : > { %775 = vmatprep.subr.bf16.mxu0 %v2209_v0  ;;  %1798 = vmatprep.subr.bf16.mxu1 %v2209_v0  ;;  %v1973_v44 = vld [vmem:[%s2418_s30 + $0x160] ss:$8 sps:$4 sm:$0xff]   ;;  %v1976_v46 = vld [vmem:[%s2418_s30 + $0x174] ss:$8 sps:$4 sm:$0xff]   ;;  %v1978_v47 = vld [vmem:[%s2418_s30 + $0x70] ss:$8 sps:$4 sm:$0xff]  }
  0x80   : > { %v1979_v48 = vld [vmem:[%s2418_s30 + $0x170] ss:$8 sps:$4 sm:$0xff]   ;;  %v1980_v49 = vld [vmem:[%s2418_s30 + $0x84] ss:$8 sps:$4 sm:$0xff]   ;;  %v1984_v51 = vld [vmem:[%s2418_s30 + $0x80] ss:$8 sps:$4 sm:$0xff]  }
  0x81   : > { %v1982_v50 = vld [vmem:[%s2418_s30 + $0x184] ss:$8 sps:$4 sm:$0xff]   ;;  %v1985_v52 = vld [vmem:[%s2418_s30 + $0x180] ss:$8 sps:$4 sm:$0xff]   ;;  %v1986_v53 = vld [vmem:[%s2418_s30 + $0x94] ss:$8 sps:$4 sm:$0xff]  }
  0x82   : > { %776 = vmatpush1.bf16.msra.mxu0 %v1920_v5  ;;  %1814 = vmatpush1.bf16.msra.mxu1 %v1920_v5  ;;  %v1988_v54 = vld [vmem:[%s2418_s30 + $0x194] ss:$8 sps:$4 sm:$0xff]   ;;  %v1990_v55 = vld [vmem:[%s2418_s30 + $0x90] ss:$8 sps:$4 sm:$0xff]   ;;  %v1992_v57 = vld [vmem:[%s2418_s30 + $0xa4] ss:$8 sps:$4 sm:$0xff]  }
  0x83   : > { %777 = vmatprep.subr.bf16.mxu0 %v2209_v0  ;;  %1799 = vmatprep.subr.bf16.mxu1 %v2209_v0  ;;  %v1991_v56 = vld [vmem:[%s2418_s30 + $0x190] ss:$8 sps:$4 sm:$0xff]   ;;  %v1994_v58 = vld [vmem:[%s2418_s30 + $0x1a4] ss:$8 sps:$4 sm:$0xff]   ;;  %v1996_v59 = vld [vmem:[%s2418_s30 + $0xa0] ss:$8 sps:$4 sm:$0xff]  }
  0x84   : > { %v1997_v60 = vld [vmem:[%s2418_s30 + $0x1a0] ss:$8 sps:$4 sm:$0xff]   ;;  %v1998_v61 = vld [vmem:[%s2418_s30 + $0xb4] ss:$8 sps:$4 sm:$0xff]   ;;  %v2002_v63 = vld [vmem:[%s2418_s30 + $0xb0] ss:$8 sps:$4 sm:$0xff]  }
  0x85   : > { %v2000_v62 = vld [vmem:[%s2418_s30 + $0x1b4] ss:$8 sps:$4 sm:$0xff]   ;;  %v2004_v1 = vld [vmem:[%s2418_s30 + $0xc4] ss:$8 sps:$4 sm:$0xff]   ;;  %v2008_v3 = vld [vmem:[%s2418_s30 + $0xc0] ss:$8 sps:$4 sm:$0xff]  }
  0x86   : > { %778 = vmatpush1.bf16.msra.mxu0 %v1921_v7  ;;  %1815 = vmatpush1.bf16.msra.mxu1 %v1921_v7  ;;  %v2006_v2 = vld [vmem:[%s2418_s30 + $0x1c4] ss:$8 sps:$4 sm:$0xff]   ;;  %v2009_v4 = vld [vmem:[%s2418_s30 + $0x1c0] ss:$8 sps:$4 sm:$0xff]   ;;  %v2010_v5 = vld [vmem:[%s2418_s30 + $0xd4] ss:$8 sps:$4 sm:$0xff]  }
  0x87   : > { %779 = vmatprep.subr.bf16.mxu0 %v2209_v0  ;;  %1800 = vmatprep.subr.bf16.mxu1 %v2209_v0  ;;  %v2012_v6 = vld [vmem:[%s2418_s30 + $0x1d4] ss:$8 sps:$4 sm:$0xff]   ;;  %v2014_v7 = vld [vmem:[%s2418_s30 + $0xd0] ss:$8 sps:$4 sm:$0xff]  }
  0x88   : > { %v2015_v8 = vld [vmem:[%s2418_s30 + $0x1d0] ss:$8 sps:$4 sm:$0xff]  }
  0x8a   : > { %780 = vmatpush1.bf16.msra.mxu0 %v1922_v9  ;;  %1816 = vmatpush1.bf16.msra.mxu1 %v1922_v9  ;;  %v2016_v9 = vld [vmem:[%s2418_s30 + $0xe4] ss:$8 sps:$4 sm:$0xff]  }
  0x8b   : > { %781 = vmatprep.subr.bf16.mxu0 %v2209_v0  ;;  %1801 = vmatprep.subr.bf16.mxu1 %v2209_v0 }
  0x8e   : > { %782 = vmatpush1.bf16.msra.mxu0 %v1923_v10  ;;  %1817 = vmatpush1.bf16.msra.mxu1 %v1923_v10  ;;  %v2018_v10 = vld [vmem:[%s2418_s30 + $0x1e4] ss:$8 sps:$4 sm:$0xff]  }
  0x8f   : > { %783 = vmatprep.subr.bf16.mxu0 %v2209_v0  ;;  %1802 = vmatprep.subr.bf16.mxu1 %v2209_v0 }
  0x92   : > { %784 = vmatpush1.bf16.msra.mxu0 %v1924_v11  ;;  %1818 = vmatpush1.bf16.msra.mxu1 %v1924_v11  ;;  %v2020_v11 = vld [vmem:[%s2418_s30 + $0xe0] ss:$8 sps:$4 sm:$0xff]  }
  0x93   : > { %785 = vmatprep.subr.bf16.mxu0 %v2209_v0  ;;  %1803 = vmatprep.subr.bf16.mxu1 %v2209_v0 }
  0x96   : > { %786 = vmatpush1.bf16.msra.mxu0 %v1925_v12  ;;  %1819 = vmatpush1.bf16.msra.mxu1 %v1925_v12  ;;  %v2021_v12 = vld [vmem:[%s2418_s30 + $0x1e0] ss:$8 sps:$4 sm:$0xff]  }
  0x97   : > { %787 = vmatprep.subr.bf16.mxu0 %v2209_v0  ;;  %1804 = vmatprep.subr.bf16.mxu1 %v2209_v0 }
  0x9a   : > { %788 = vmatpush1.bf16.msra.mxu0 %v1926_v13  ;;  %1820 = vmatpush1.bf16.msra.mxu1 %v1926_v13  ;;  %v2022_v13 = vld [vmem:[%s2418_s30 + $0xf4] ss:$8 sps:$4 sm:$0xff]  }
  0x9b   : > { %789 = vmatprep.subr.bf16.mxu0 %v2209_v0  ;;  %1805 = vmatprep.subr.bf16.mxu1 %v2209_v0 }
  0x9e   : > { %790 = vmatpush1.bf16.msra.mxu0 %v1927_v14  ;;  %1821 = vmatpush1.bf16.msra.mxu1 %v1927_v14  ;;  %v2024_v14 = vld [vmem:[%s2418_s30 + $0x1f4] ss:$8 sps:$4 sm:$0xff]  }
  0x9f   : > { %791 = vmatprep.subr.bf16.mxu0 %v2209_v0  ;;  %1806 = vmatprep.subr.bf16.mxu1 %v2209_v0 }
  0xa2   : > { %792 = vmatpush1.bf16.msra.mxu0 %v1928_v15  ;;  %1822 = vmatpush1.bf16.msra.mxu1 %v1928_v15  ;;  %v2026_v15 = vld [vmem:[%s2418_s30 + $0xf0] ss:$8 sps:$4 sm:$0xff]  }
  0xa3   : > { %793 = vmatprep.subr.bf16.mxu0 %v2209_v0  ;;  %1807 = vmatprep.subr.bf16.mxu1 %v2209_v0 }
  0xa6   : > { %794 = vmatpush1.bf16.msra.mxu0 %v1929_v16  ;;  %1823 = vmatpush1.bf16.msra.mxu1 %v1929_v16  ;;  %v2027_v16 = vld [vmem:[%s2418_s30 + $0x1f0] ss:$8 sps:$4 sm:$0xff]  }
  0xa7   : > { %795 = vmatprep.subr.bf16.mxu0 %v2209_v0  ;;  %1808 = vmatprep.subr.bf16.mxu1 %v2209_v0 }
  0xaa   : > { %796 = vmatpush1.bf16.msra.mxu0 %v1930_v17  ;;  %1824 = vmatpush1.bf16.msra.mxu1 %v1930_v17  ;;  %v2524_v17 = vld [vmem:[#allocation7] ss:$0 sm:$0xff] }
  0xab   : > { %797 = vmatprep.subr.bf16.mxu0 %v2209_v0  ;;  %1809 = vmatprep.subr.bf16.mxu1 %v2209_v0  ;;  %v2003_v0 = vld [vmem:[%s2418_s30 + $0x1b0] ss:$8 sps:$4 sm:$0xff]  }
  0xae   : > { %798 = vmatpush1.bf16.msra.mxu0 %v1931_v18  ;;  %1825 = vmatpush1.bf16.msra.mxu1 %v1931_v18 }
  0xb1   : > { %800 = vmatmul.mubr.bf16.vlgmr.msra.gmra.mrb[0].mxu0 %v1932_v19  ;;  %928 = vmatmul.mubr.bf16.vlgmr.msra.gmra.mrb[0].mxu1 %v1935_v20 }
  0xb2   : > { %807 = vmatprep.mubr.bf16.mxu0 %v1938_v21  ;;  %935 = vmatprep.mubr.bf16.mxu1 %v1940_v22 }
  0xb9   : > { %808 = vmatmul.mubr.bf16.gmra.mrb[4].mxu0 %v1942_v23  ;;  %936 = vmatmul.mubr.bf16.gmra.mrb[4].mxu1 %v1943_v24 }
  0xba   : > { %815 = vmatprep.mubr.bf16.mxu0 %v1944_v25  ;;  %943 = vmatprep.mubr.bf16.mxu1 %v1946_v26 }
  0xc1   : > { %816 = vmatmul.mubr.bf16.gmra.mrb[8].mxu0 %v1948_v27  ;;  %944 = vmatmul.mubr.bf16.gmra.mrb[8].mxu1 %v1949_v28 }
  0xc2   : > { %823 = vmatprep.mubr.bf16.mxu0 %v1950_v29  ;;  %951 = vmatprep.mubr.bf16.mxu1 %v1952_v30 }
  0xc9   : > { %824 = vmatmul.mubr.bf16.gmra.mrb[12].mxu0 %v1954_v31  ;;  %952 = vmatmul.mubr.bf16.gmra.mrb[12].mxu1 %v1955_v32 }
  0xca   : > { %831 = vmatprep.mubr.bf16.mxu0 %v1956_v33  ;;  %959 = vmatprep.mubr.bf16.mxu1 %v1958_v34 }
  0xd1   : > { %832 = vmatmul.mubr.bf16.gmra.mrb[16].mxu0 %v1960_v35  ;;  %960 = vmatmul.mubr.bf16.gmra.mrb[16].mxu1 %v1961_v36 }
  0xd2   : > { %839 = vmatprep.mubr.bf16.mxu0 %v1962_v37  ;;  %967 = vmatprep.mubr.bf16.mxu1 %v1964_v38 }
  0xd9   : > { %840 = vmatmul.mubr.bf16.gmra.mrb[20].mxu0 %v1966_v39  ;;  %968 = vmatmul.mubr.bf16.gmra.mrb[20].mxu1 %v1967_v40 }
  0xda   : > { %847 = vmatprep.mubr.bf16.mxu0 %v1968_v41  ;;  %975 = vmatprep.mubr.bf16.mxu1 %v1970_v42 }
  0xe1   : > { %848 = vmatmul.mubr.bf16.gmra.mrb[24].mxu0 %v1972_v43  ;;  %976 = vmatmul.mubr.bf16.gmra.mrb[24].mxu1 %v1973_v44 }
  0xe2   : > { %855 = vmatprep.mubr.bf16.mxu0 %v1974_v45  ;;  %983 = vmatprep.mubr.bf16.mxu1 %v1976_v46 }
  0xe9   : > { %856 = vmatmul.mubr.bf16.gmra.mrb[28].mxu0 %v1978_v47  ;;  %984 = vmatmul.mubr.bf16.gmra.mrb[28].mxu1 %v1979_v48 }
  0xea   : > { %863 = vmatprep.mubr.bf16.mxu0 %v1980_v49  ;;  %991 = vmatprep.mubr.bf16.mxu1 %v1982_v50 }
  0xf1   : > { %864 = vmatmul.mubr.bf16.gmra.mrb[32].mxu0 %v1984_v51  ;;  %992 = vmatmul.mubr.bf16.gmra.mrb[32].mxu1 %v1985_v52 }
  0xf2   : > { %871 = vmatprep.mubr.bf16.mxu0 %v1986_v53  ;;  %999 = vmatprep.mubr.bf16.mxu1 %v1988_v54 }
  0xf9   : > { %872 = vmatmul.mubr.bf16.gmra.mrb[36].mxu0 %v1990_v55  ;;  %1000 = vmatmul.mubr.bf16.gmra.mrb[36].mxu1 %v1991_v56 }
  0xfa   : > { %879 = vmatprep.mubr.bf16.mxu0 %v1992_v57  ;;  %1007 = vmatprep.mubr.bf16.mxu1 %v1994_v58 }
 0x101   : > { %880 = vmatmul.mubr.bf16.gmra.mrb[40].mxu0 %v1996_v59  ;;  %1008 = vmatmul.mubr.bf16.gmra.mrb[40].mxu1 %v1997_v60 }
 0x102   : > { %887 = vmatprep.mubr.bf16.mxu0 %v1998_v61  ;;  %1015 = vmatprep.mubr.bf16.mxu1 %v2000_v62 }
 0x109   : > { %888 = vmatmul.mubr.bf16.gmra.mrb[44].mxu0 %v2002_v63  ;;  %1016 = vmatmul.mubr.bf16.gmra.mrb[44].mxu1 %v2003_v0 }
 0x10a   : > { %895 = vmatprep.mubr.bf16.mxu0 %v2004_v1  ;;  %1023 = vmatprep.mubr.bf16.mxu1 %v2006_v2 }
 0x111   : > { %896 = vmatmul.mubr.bf16.gmra.mrb[48].mxu0 %v2008_v3  ;;  %1024 = vmatmul.mubr.bf16.gmra.mrb[48].mxu1 %v2009_v4 }
 0x112   : > { %903 = vmatprep.mubr.bf16.mxu0 %v2010_v5  ;;  %1031 = vmatprep.mubr.bf16.mxu1 %v2012_v6 }
 0x119   : > { %904 = vmatmul.mubr.bf16.gmra.mrb[52].mxu0 %v2014_v7  ;;  %1032 = vmatmul.mubr.bf16.gmra.mrb[52].mxu1 %v2015_v8 }
 0x11a   : > { %911 = vmatprep.mubr.bf16.mxu0 %v2016_v9  ;;  %1039 = vmatprep.mubr.bf16.mxu1 %v2018_v10 }
 0x121   : > { %912 = vmatmul.mubr.bf16.gmra.mrb[56].mxu0 %v2020_v11  ;;  %1040 = vmatmul.mubr.bf16.gmra.mrb[56].mxu1 %v2021_v12 }
 0x122   : > { %919 = vmatprep.mubr.bf16.mxu0 %v2022_v13  ;;  %1047 = vmatprep.mubr.bf16.mxu1 %v2024_v14 }
 0x129   : > { %920 = vmatmul.mubr.bf16.gmra.mrb[60].mxu0 %v2026_v15  ;;  %1048 = vmatmul.mubr.bf16.gmra.mrb[60].mxu1 %v2027_v16 }
 0x184   : > { %v801_v18 = vpop.f32.mrb[0].mxu0  ;;  %v929_v19 = vpop.f32.mrb[0].mxu1 }
 0x185   : > { %v802_v20 = vadd.f32 %v2524_v17, %v801_v18  ;;  %v930_v21 = vadd.f32 %v2524_v17, %v929_v19  ;;  %v803_v22 = vpop.f32.mrb[1].mxu0  ;;  %v931_v23 = vpop.f32.mrb[1].mxu1 }
 0x186   : > { %v804_v24 = vpop.f32.mrb[2].mxu0  ;;  %v932_v25 = vpop.f32.mrb[2].mxu1 }
 0x187   : > { %v1056_v26 = vmax.f32 %v802_v20, 0.0  ;;  %v1088_v27 = vmax.f32 %v930_v21, 0.0  ;;  %v805_v28 = vadd.f32 %v2524_v17, %v804_v24  ;;  %v933_v29 = vadd.f32 %v2524_v17, %v932_v25  ;;  %v806_v30 = vpop.f32.mrb[3].mxu0  ;;  %v934_v31 = vpop.f32.mrb[3].mxu1 }
 0x189   : > { %v1729_v32 = vpack.c.bf16 %v1056_v26, %v1056_v26  ;;  %v1761_v33 = vpack.c.bf16 %v1088_v27, %v1088_v27  ;;  %v1057_v34 = vmax.f32 %v805_v28, 0.0  ;;  %v1089_v35 = vmax.f32 %v933_v29, 0.0 }
 0x18b   : > { %1377 = vst.msk [vmem:[%s2531_s22] sm:$0xf] %vm1376_vm0, %v1729_v32  ;;  %1409 = vst.msk [vmem:[%s2531_s22 + $0x80] sm:$0xf] %vm1376_vm0, %v1761_v33  ;;  %v1730_v36 = vpack.c.bf16 %v1057_v34, %v1057_v34  ;;  %v1762_v37 = vpack.c.bf16 %v1089_v35, %v1089_v35 }
 0x18c   : > { %v809_v38 = vpop.f32.mrb[4].mxu0  ;;  %v937_v39 = vpop.f32.mrb[4].mxu1 }
 0x18d   : > { %1378 = vst.msk [vmem:[%s2531_s22 + $0x4] sm:$0xf] %vm1376_vm0, %v1730_v36  ;;  %1410 = vst.msk [vmem:[%s2531_s22 + $0x84] sm:$0xf] %vm1376_vm0, %v1762_v37  ;;  %v810_v40 = vadd.f32 %v2524_v17, %v809_v38  ;;  %v938_v41 = vadd.f32 %v2524_v17, %v937_v39  ;;  %v811_v42 = vpop.f32.mrb[5].mxu0  ;;  %v939_v43 = vpop.f32.mrb[5].mxu1 }
 0x18e   : > { %v812_v44 = vpop.f32.mrb[6].mxu0  ;;  %v940_v45 = vpop.f32.mrb[6].mxu1 }
 0x18f   : > { %v1058_v46 = vmax.f32 %v810_v40, 0.0  ;;  %v1090_v47 = vmax.f32 %v938_v41, 0.0  ;;  %v813_v48 = vadd.f32 %v2524_v17, %v812_v44  ;;  %v941_v49 = vadd.f32 %v2524_v17, %v940_v45  ;;  %v814_v50 = vpop.f32.mrb[7].mxu0  ;;  %v942_v51 = vpop.f32.mrb[7].mxu1 }
 0x191   : > { %v1731_v52 = vpack.c.bf16 %v1058_v46, %v1058_v46  ;;  %v1763_v53 = vpack.c.bf16 %v1090_v47, %v1090_v47  ;;  %v1059_v54 = vmax.f32 %v813_v48, 0.0  ;;  %v1091_v55 = vmax.f32 %v941_v49, 0.0 }
 0x193   : > { %1379 = vst.msk [vmem:[%s2531_s22 + $0x8] sm:$0xf] %vm1376_vm0, %v1731_v52  ;;  %1411 = vst.msk [vmem:[%s2531_s22 + $0x88] sm:$0xf] %vm1376_vm0, %v1763_v53  ;;  %v1732_v56 = vpack.c.bf16 %v1059_v54, %v1059_v54  ;;  %v1764_v57 = vpack.c.bf16 %v1091_v55, %v1091_v55 }
 0x194   : > { %v817_v58 = vpop.f32.mrb[8].mxu0  ;;  %v945_v59 = vpop.f32.mrb[8].mxu1 }
 0x195   : > { %1380 = vst.msk [vmem:[%s2531_s22 + $0xc] sm:$0xf] %vm1376_vm0, %v1732_v56  ;;  %1412 = vst.msk [vmem:[%s2531_s22 + $0x8c] sm:$0xf] %vm1376_vm0, %v1764_v57  ;;  %v818_v60 = vadd.f32 %v2524_v17, %v817_v58  ;;  %v946_v61 = vadd.f32 %v2524_v17, %v945_v59  ;;  %v819_v62 = vpop.f32.mrb[9].mxu0  ;;  %v947_v63 = vpop.f32.mrb[9].mxu1 }
 0x196   : > { %v820_v0 = vpop.f32.mrb[10].mxu0  ;;  %v948_v1 = vpop.f32.mrb[10].mxu1 }
 0x197   : > { %v1060_v2 = vmax.f32 %v818_v60, 0.0  ;;  %v1092_v3 = vmax.f32 %v946_v61, 0.0  ;;  %v821_v4 = vadd.f32 %v2524_v17, %v820_v0  ;;  %v949_v5 = vadd.f32 %v2524_v17, %v948_v1  ;;  %v822_v6 = vpop.f32.mrb[11].mxu0  ;;  %v950_v7 = vpop.f32.mrb[11].mxu1 }
 0x199   : > { %v1733_v8 = vpack.c.bf16 %v1060_v2, %v1060_v2  ;;  %v1765_v9 = vpack.c.bf16 %v1092_v3, %v1092_v3  ;;  %v1061_v10 = vmax.f32 %v821_v4, 0.0  ;;  %v1093_v11 = vmax.f32 %v949_v5, 0.0 }
 0x19b   : > { %1381 = vst.msk [vmem:[%s2531_s22 + $0x10] sm:$0xf] %vm1376_vm0, %v1733_v8  ;;  %1413 = vst.msk [vmem:[%s2531_s22 + $0x90] sm:$0xf] %vm1376_vm0, %v1765_v9  ;;  %v1734_v12 = vpack.c.bf16 %v1061_v10, %v1061_v10  ;;  %v1766_v13 = vpack.c.bf16 %v1093_v11, %v1093_v11 }
 0x19c   : > { %v825_v14 = vpop.f32.mrb[12].mxu0  ;;  %v953_v15 = vpop.f32.mrb[12].mxu1 }
 0x19d   : > { %1382 = vst.msk [vmem:[%s2531_s22 + $0x14] sm:$0xf] %vm1376_vm0, %v1734_v12  ;;  %1414 = vst.msk [vmem:[%s2531_s22 + $0x94] sm:$0xf] %vm1376_vm0, %v1766_v13  ;;  %v826_v16 = vadd.f32 %v2524_v17, %v825_v14  ;;  %v954_v18 = vadd.f32 %v2524_v17, %v953_v15  ;;  %v827_v19 = vpop.f32.mrb[13].mxu0  ;;  %v955_v20 = vpop.f32.mrb[13].mxu1 }
 0x19e   : > { %v828_v21 = vpop.f32.mrb[14].mxu0  ;;  %v956_v22 = vpop.f32.mrb[14].mxu1 }
 0x19f   : > { %v1062_v23 = vmax.f32 %v826_v16, 0.0  ;;  %v1094_v24 = vmax.f32 %v954_v18, 0.0  ;;  %v829_v25 = vadd.f32 %v2524_v17, %v828_v21  ;;  %v957_v26 = vadd.f32 %v2524_v17, %v956_v22  ;;  %v830_v27 = vpop.f32.mrb[15].mxu0  ;;  %v958_v28 = vpop.f32.mrb[15].mxu1 }
 0x1a1   : > { %v1735_v29 = vpack.c.bf16 %v1062_v23, %v1062_v23  ;;  %v1767_v30 = vpack.c.bf16 %v1094_v24, %v1094_v24  ;;  %v1063_v31 = vmax.f32 %v829_v25, 0.0  ;;  %v1095_v32 = vmax.f32 %v957_v26, 0.0 }
 0x1a3   : > { %1383 = vst.msk [vmem:[%s2531_s22 + $0x18] sm:$0xf] %vm1376_vm0, %v1735_v29  ;;  %1415 = vst.msk [vmem:[%s2531_s22 + $0x98] sm:$0xf] %vm1376_vm0, %v1767_v30  ;;  %v1736_v33 = vpack.c.bf16 %v1063_v31, %v1063_v31  ;;  %v1768_v34 = vpack.c.bf16 %v1095_v32, %v1095_v32 }
 0x1a4   : > { %v833_v35 = vpop.f32.mrb[16].mxu0  ;;  %v961_v36 = vpop.f32.mrb[16].mxu1 }
 0x1a5   : > { %1384 = vst.msk [vmem:[%s2531_s22 + $0x1c] sm:$0xf] %vm1376_vm0, %v1736_v33  ;;  %1416 = vst.msk [vmem:[%s2531_s22 + $0x9c] sm:$0xf] %vm1376_vm0, %v1768_v34  ;;  %v834_v37 = vadd.f32 %v2524_v17, %v833_v35  ;;  %v962_v38 = vadd.f32 %v2524_v17, %v961_v36  ;;  %v835_v39 = vpop.f32.mrb[17].mxu0  ;;  %v963_v40 = vpop.f32.mrb[17].mxu1 }
 0x1a6   : > { %v836_v41 = vpop.f32.mrb[18].mxu0  ;;  %v964_v42 = vpop.f32.mrb[18].mxu1 }
 0x1a7   : > { %v1064_v43 = vmax.f32 %v834_v37, 0.0  ;;  %v1096_v44 = vmax.f32 %v962_v38, 0.0  ;;  %v837_v45 = vadd.f32 %v2524_v17, %v836_v41  ;;  %v965_v46 = vadd.f32 %v2524_v17, %v964_v42  ;;  %v838_v47 = vpop.f32.mrb[19].mxu0  ;;  %v966_v48 = vpop.f32.mrb[19].mxu1 }
 0x1a9   : > { %v1737_v49 = vpack.c.bf16 %v1064_v43, %v1064_v43  ;;  %v1769_v50 = vpack.c.bf16 %v1096_v44, %v1096_v44  ;;  %v1065_v51 = vmax.f32 %v837_v45, 0.0  ;;  %v1097_v52 = vmax.f32 %v965_v46, 0.0 }
 0x1ab   : > { %1385 = vst.msk [vmem:[%s2531_s22 + $0x20] sm:$0xf] %vm1376_vm0, %v1737_v49  ;;  %1417 = vst.msk [vmem:[%s2531_s22 + $0xa0] sm:$0xf] %vm1376_vm0, %v1769_v50  ;;  %v1738_v53 = vpack.c.bf16 %v1065_v51, %v1065_v51  ;;  %v1770_v54 = vpack.c.bf16 %v1097_v52, %v1097_v52 }
 0x1ac   : > { %v841_v55 = vpop.f32.mrb[20].mxu0  ;;  %v969_v56 = vpop.f32.mrb[20].mxu1 }
 0x1ad   : > { %1386 = vst.msk [vmem:[%s2531_s22 + $0x24] sm:$0xf] %vm1376_vm0, %v1738_v53  ;;  %1418 = vst.msk [vmem:[%s2531_s22 + $0xa4] sm:$0xf] %vm1376_vm0, %v1770_v54  ;;  %v842_v57 = vadd.f32 %v2524_v17, %v841_v55  ;;  %v970_v58 = vadd.f32 %v2524_v17, %v969_v56  ;;  %v843_v59 = vpop.f32.mrb[21].mxu0  ;;  %v971_v60 = vpop.f32.mrb[21].mxu1 }
 0x1ae   : > { %v844_v61 = vpop.f32.mrb[22].mxu0  ;;  %v972_v62 = vpop.f32.mrb[22].mxu1 }
 0x1af   : > { %v1066_v63 = vmax.f32 %v842_v57, 0.0  ;;  %v1098_v0 = vmax.f32 %v970_v58, 0.0  ;;  %v845_v1 = vadd.f32 %v2524_v17, %v844_v61  ;;  %v973_v2 = vadd.f32 %v2524_v17, %v972_v62  ;;  %v846_v3 = vpop.f32.mrb[23].mxu0  ;;  %v974_v4 = vpop.f32.mrb[23].mxu1 }
 0x1b1   : > { %v1739_v5 = vpack.c.bf16 %v1066_v63, %v1066_v63  ;;  %v1771_v6 = vpack.c.bf16 %v1098_v0, %v1098_v0  ;;  %v1067_v7 = vmax.f32 %v845_v1, 0.0  ;;  %v1099_v8 = vmax.f32 %v973_v2, 0.0 }
 0x1b3   : > { %1387 = vst.msk [vmem:[%s2531_s22 + $0x28] sm:$0xf] %vm1376_vm0, %v1739_v5  ;;  %1419 = vst.msk [vmem:[%s2531_s22 + $0xa8] sm:$0xf] %vm1376_vm0, %v1771_v6  ;;  %v1740_v9 = vpack.c.bf16 %v1067_v7, %v1067_v7  ;;  %v1772_v10 = vpack.c.bf16 %v1099_v8, %v1099_v8 }
 0x1b4   : > { %v849_v11 = vpop.f32.mrb[24].mxu0  ;;  %v977_v12 = vpop.f32.mrb[24].mxu1 }
 0x1b5   : > { %1388 = vst.msk [vmem:[%s2531_s22 + $0x2c] sm:$0xf] %vm1376_vm0, %v1740_v9  ;;  %1420 = vst.msk [vmem:[%s2531_s22 + $0xac] sm:$0xf] %vm1376_vm0, %v1772_v10  ;;  %v850_v13 = vadd.f32 %v2524_v17, %v849_v11  ;;  %v978_v14 = vadd.f32 %v2524_v17, %v977_v12  ;;  %v851_v15 = vpop.f32.mrb[25].mxu0  ;;  %v979_v16 = vpop.f32.mrb[25].mxu1 }
 0x1b6   : > { %v852_v18 = vpop.f32.mrb[26].mxu0  ;;  %v980_v19 = vpop.f32.mrb[26].mxu1 }
 0x1b7   : > { %v1068_v20 = vmax.f32 %v850_v13, 0.0  ;;  %v1100_v21 = vmax.f32 %v978_v14, 0.0  ;;  %v853_v22 = vadd.f32 %v2524_v17, %v852_v18  ;;  %v981_v23 = vadd.f32 %v2524_v17, %v980_v19  ;;  %v854_v24 = vpop.f32.mrb[27].mxu0  ;;  %v982_v25 = vpop.f32.mrb[27].mxu1 }
 0x1b9   : > { %v1741_v26 = vpack.c.bf16 %v1068_v20, %v1068_v20  ;;  %v1773_v27 = vpack.c.bf16 %v1100_v21, %v1100_v21  ;;  %v1069_v28 = vmax.f32 %v853_v22, 0.0  ;;  %v1101_v29 = vmax.f32 %v981_v23, 0.0 }
 0x1bb   : > { %1389 = vst.msk [vmem:[%s2531_s22 + $0x30] sm:$0xf] %vm1376_vm0, %v1741_v26  ;;  %1421 = vst.msk [vmem:[%s2531_s22 + $0xb0] sm:$0xf] %vm1376_vm0, %v1773_v27  ;;  %v1742_v30 = vpack.c.bf16 %v1069_v28, %v1069_v28  ;;  %v1774_v31 = vpack.c.bf16 %v1101_v29, %v1101_v29 }
 0x1bc   : > { %v857_v32 = vpop.f32.mrb[28].mxu0  ;;  %v985_v33 = vpop.f32.mrb[28].mxu1 }
 0x1bd   : > { %1390 = vst.msk [vmem:[%s2531_s22 + $0x34] sm:$0xf] %vm1376_vm0, %v1742_v30  ;;  %1422 = vst.msk [vmem:[%s2531_s22 + $0xb4] sm:$0xf] %vm1376_vm0, %v1774_v31  ;;  %v858_v34 = vadd.f32 %v2524_v17, %v857_v32  ;;  %v986_v35 = vadd.f32 %v2524_v17, %v985_v33  ;;  %v859_v36 = vpop.f32.mrb[29].mxu0  ;;  %v987_v37 = vpop.f32.mrb[29].mxu1 }
 0x1be   : > { %v860_v38 = vpop.f32.mrb[30].mxu0  ;;  %v988_v39 = vpop.f32.mrb[30].mxu1 }
 0x1bf   : > { %v1070_v40 = vmax.f32 %v858_v34, 0.0  ;;  %v1102_v41 = vmax.f32 %v986_v35, 0.0  ;;  %v861_v42 = vadd.f32 %v2524_v17, %v860_v38  ;;  %v989_v43 = vadd.f32 %v2524_v17, %v988_v39  ;;  %v862_v44 = vpop.f32.mrb[31].mxu0  ;;  %v990_v45 = vpop.f32.mrb[31].mxu1 }
 0x1c1   : > { %v1743_v46 = vpack.c.bf16 %v1070_v40, %v1070_v40  ;;  %v1775_v47 = vpack.c.bf16 %v1102_v41, %v1102_v41  ;;  %v1071_v48 = vmax.f32 %v861_v42, 0.0  ;;  %v1103_v49 = vmax.f32 %v989_v43, 0.0 }
 0x1c3   : > { %1391 = vst.msk [vmem:[%s2531_s22 + $0x38] sm:$0xf] %vm1376_vm0, %v1743_v46  ;;  %1423 = vst.msk [vmem:[%s2531_s22 + $0xb8] sm:$0xf] %vm1376_vm0, %v1775_v47  ;;  %v1744_v50 = vpack.c.bf16 %v1071_v48, %v1071_v48  ;;  %v1776_v51 = vpack.c.bf16 %v1103_v49, %v1103_v49 }
 0x1c4   : > { %v865_v52 = vpop.f32.mrb[32].mxu0  ;;  %v993_v53 = vpop.f32.mrb[32].mxu1 }
 0x1c5   : > { %1392 = vst.msk [vmem:[%s2531_s22 + $0x3c] sm:$0xf] %vm1376_vm0, %v1744_v50  ;;  %1424 = vst.msk [vmem:[%s2531_s22 + $0xbc] sm:$0xf] %vm1376_vm0, %v1776_v51  ;;  %v866_v54 = vadd.f32 %v2524_v17, %v865_v52  ;;  %v994_v55 = vadd.f32 %v2524_v17, %v993_v53  ;;  %v867_v56 = vpop.f32.mrb[33].mxu0  ;;  %v995_v57 = vpop.f32.mrb[33].mxu1 }
 0x1c6   : > { %v868_v58 = vpop.f32.mrb[34].mxu0  ;;  %v996_v59 = vpop.f32.mrb[34].mxu1 }
 0x1c7   : > { %v1072_v60 = vmax.f32 %v866_v54, 0.0  ;;  %v1104_v61 = vmax.f32 %v994_v55, 0.0  ;;  %v869_v62 = vadd.f32 %v2524_v17, %v868_v58  ;;  %v997_v63 = vadd.f32 %v2524_v17, %v996_v59  ;;  %v870_v0 = vpop.f32.mrb[35].mxu0  ;;  %v998_v1 = vpop.f32.mrb[35].mxu1 }
 0x1c9   : > { %v1745_v2 = vpack.c.bf16 %v1072_v60, %v1072_v60  ;;  %v1777_v3 = vpack.c.bf16 %v1104_v61, %v1104_v61  ;;  %v1073_v4 = vmax.f32 %v869_v62, 0.0  ;;  %v1105_v5 = vmax.f32 %v997_v63, 0.0 }
 0x1cb   : > { %1393 = vst.msk [vmem:[%s2531_s22 + $0x40] sm:$0xf] %vm1376_vm0, %v1745_v2  ;;  %1425 = vst.msk [vmem:[%s2531_s22 + $0xc0] sm:$0xf] %vm1376_vm0, %v1777_v3  ;;  %v1746_v6 = vpack.c.bf16 %v1073_v4, %v1073_v4  ;;  %v1778_v7 = vpack.c.bf16 %v1105_v5, %v1105_v5 }
 0x1cc   : > { %v873_v8 = vpop.f32.mrb[36].mxu0  ;;  %v1001_v9 = vpop.f32.mrb[36].mxu1 }
 0x1cd   : > { %1394 = vst.msk [vmem:[%s2531_s22 + $0x44] sm:$0xf] %vm1376_vm0, %v1746_v6  ;;  %1426 = vst.msk [vmem:[%s2531_s22 + $0xc4] sm:$0xf] %vm1376_vm0, %v1778_v7  ;;  %v874_v10 = vadd.f32 %v2524_v17, %v873_v8  ;;  %v1002_v11 = vadd.f32 %v2524_v17, %v1001_v9  ;;  %v875_v12 = vpop.f32.mrb[37].mxu0  ;;  %v1003_v13 = vpop.f32.mrb[37].mxu1 }
 0x1ce   : > { %v876_v14 = vpop.f32.mrb[38].mxu0  ;;  %v1004_v15 = vpop.f32.mrb[38].mxu1 }
 0x1cf   : > { %v1074_v16 = vmax.f32 %v874_v10, 0.0  ;;  %v1106_v18 = vmax.f32 %v1002_v11, 0.0  ;;  %v877_v19 = vadd.f32 %v2524_v17, %v876_v14  ;;  %v1005_v20 = vadd.f32 %v2524_v17, %v1004_v15  ;;  %v878_v21 = vpop.f32.mrb[39].mxu0  ;;  %v1006_v22 = vpop.f32.mrb[39].mxu1 }
 0x1d1   : > { %v1747_v23 = vpack.c.bf16 %v1074_v16, %v1074_v16  ;;  %v1779_v24 = vpack.c.bf16 %v1106_v18, %v1106_v18  ;;  %v1075_v25 = vmax.f32 %v877_v19, 0.0  ;;  %v1107_v26 = vmax.f32 %v1005_v20, 0.0 }
 0x1d3   : > { %1395 = vst.msk [vmem:[%s2531_s22 + $0x48] sm:$0xf] %vm1376_vm0, %v1747_v23  ;;  %1427 = vst.msk [vmem:[%s2531_s22 + $0xc8] sm:$0xf] %vm1376_vm0, %v1779_v24  ;;  %v1748_v27 = vpack.c.bf16 %v1075_v25, %v1075_v25  ;;  %v1780_v28 = vpack.c.bf16 %v1107_v26, %v1107_v26 }
 0x1d4   : > { %v881_v29 = vpop.f32.mrb[40].mxu0  ;;  %v1009_v30 = vpop.f32.mrb[40].mxu1 }
 0x1d5   : > { %1396 = vst.msk [vmem:[%s2531_s22 + $0x4c] sm:$0xf] %vm1376_vm0, %v1748_v27  ;;  %1428 = vst.msk [vmem:[%s2531_s22 + $0xcc] sm:$0xf] %vm1376_vm0, %v1780_v28  ;;  %v882_v31 = vadd.f32 %v2524_v17, %v881_v29  ;;  %v1010_v32 = vadd.f32 %v2524_v17, %v1009_v30  ;;  %v883_v33 = vpop.f32.mrb[41].mxu0  ;;  %v1011_v34 = vpop.f32.mrb[41].mxu1 }
 0x1d6   : > { %v884_v35 = vpop.f32.mrb[42].mxu0  ;;  %v1012_v36 = vpop.f32.mrb[42].mxu1 }
 0x1d7   : > { %v1076_v37 = vmax.f32 %v882_v31, 0.0  ;;  %v1108_v38 = vmax.f32 %v1010_v32, 0.0  ;;  %v885_v39 = vadd.f32 %v2524_v17, %v884_v35  ;;  %v1013_v40 = vadd.f32 %v2524_v17, %v1012_v36  ;;  %v886_v41 = vpop.f32.mrb[43].mxu0  ;;  %v1014_v42 = vpop.f32.mrb[43].mxu1 }
 0x1d9   : > { %v1749_v43 = vpack.c.bf16 %v1076_v37, %v1076_v37  ;;  %v1781_v44 = vpack.c.bf16 %v1108_v38, %v1108_v38  ;;  %v1077_v45 = vmax.f32 %v885_v39, 0.0  ;;  %v1109_v46 = vmax.f32 %v1013_v40, 0.0 }
 0x1db   : > { %1397 = vst.msk [vmem:[%s2531_s22 + $0x50] sm:$0xf] %vm1376_vm0, %v1749_v43  ;;  %1429 = vst.msk [vmem:[%s2531_s22 + $0xd0] sm:$0xf] %vm1376_vm0, %v1781_v44  ;;  %v1750_v47 = vpack.c.bf16 %v1077_v45, %v1077_v45  ;;  %v1782_v48 = vpack.c.bf16 %v1109_v46, %v1109_v46 }
 0x1dc   : > { %v889_v49 = vpop.f32.mrb[44].mxu0  ;;  %v1017_v50 = vpop.f32.mrb[44].mxu1 }
 0x1dd   : > { %1398 = vst.msk [vmem:[%s2531_s22 + $0x54] sm:$0xf] %vm1376_vm0, %v1750_v47  ;;  %1430 = vst.msk [vmem:[%s2531_s22 + $0xd4] sm:$0xf] %vm1376_vm0, %v1782_v48  ;;  %v890_v51 = vadd.f32 %v2524_v17, %v889_v49  ;;  %v1018_v52 = vadd.f32 %v2524_v17, %v1017_v50  ;;  %v891_v53 = vpop.f32.mrb[45].mxu0  ;;  %v1019_v54 = vpop.f32.mrb[45].mxu1 }
 0x1de   : > { %v892_v55 = vpop.f32.mrb[46].mxu0  ;;  %v1020_v56 = vpop.f32.mrb[46].mxu1 }
 0x1df   : > { %v1078_v57 = vmax.f32 %v890_v51, 0.0  ;;  %v1110_v58 = vmax.f32 %v1018_v52, 0.0  ;;  %v893_v59 = vadd.f32 %v2524_v17, %v892_v55  ;;  %v1021_v60 = vadd.f32 %v2524_v17, %v1020_v56  ;;  %v894_v61 = vpop.f32.mrb[47].mxu0  ;;  %v1022_v62 = vpop.f32.mrb[47].mxu1 }
 0x1e1   : > { %v1751_v63 = vpack.c.bf16 %v1078_v57, %v1078_v57  ;;  %v1783_v0 = vpack.c.bf16 %v1110_v58, %v1110_v58  ;;  %v1079_v1 = vmax.f32 %v893_v59, 0.0  ;;  %v1111_v2 = vmax.f32 %v1021_v60, 0.0 }
 0x1e3   : > { %1399 = vst.msk [vmem:[%s2531_s22 + $0x58] sm:$0xf] %vm1376_vm0, %v1751_v63  ;;  %1431 = vst.msk [vmem:[%s2531_s22 + $0xd8] sm:$0xf] %vm1376_vm0, %v1783_v0  ;;  %v1752_v3 = vpack.c.bf16 %v1079_v1, %v1079_v1  ;;  %v1784_v4 = vpack.c.bf16 %v1111_v2, %v1111_v2 }
 0x1e4   : > { %v897_v5 = vpop.f32.mrb[48].mxu0  ;;  %v1025_v6 = vpop.f32.mrb[48].mxu1 }
 0x1e5   : > { %1400 = vst.msk [vmem:[%s2531_s22 + $0x5c] sm:$0xf] %vm1376_vm0, %v1752_v3  ;;  %1432 = vst.msk [vmem:[%s2531_s22 + $0xdc] sm:$0xf] %vm1376_vm0, %v1784_v4  ;;  %v898_v7 = vadd.f32 %v2524_v17, %v897_v5  ;;  %v1026_v8 = vadd.f32 %v2524_v17, %v1025_v6  ;;  %v899_v9 = vpop.f32.mrb[49].mxu0  ;;  %v1027_v10 = vpop.f32.mrb[49].mxu1 }
 0x1e6   : > { %v900_v11 = vpop.f32.mrb[50].mxu0  ;;  %v1028_v12 = vpop.f32.mrb[50].mxu1 }
 0x1e7   : > { %v1080_v13 = vmax.f32 %v898_v7, 0.0  ;;  %v1112_v14 = vmax.f32 %v1026_v8, 0.0  ;;  %v901_v15 = vadd.f32 %v2524_v17, %v900_v11  ;;  %v1029_v16 = vadd.f32 %v2524_v17, %v1028_v12  ;;  %v902_v18 = vpop.f32.mrb[51].mxu0  ;;  %v1030_v19 = vpop.f32.mrb[51].mxu1 }
 0x1e9   : > { %v1753_v20 = vpack.c.bf16 %v1080_v13, %v1080_v13  ;;  %v1785_v21 = vpack.c.bf16 %v1112_v14, %v1112_v14  ;;  %v1081_v22 = vmax.f32 %v901_v15, 0.0  ;;  %v1113_v23 = vmax.f32 %v1029_v16, 0.0 }
 0x1eb   : > { %1401 = vst.msk [vmem:[%s2531_s22 + $0x60] sm:$0xf] %vm1376_vm0, %v1753_v20  ;;  %1433 = vst.msk [vmem:[%s2531_s22 + $0xe0] sm:$0xf] %vm1376_vm0, %v1785_v21  ;;  %v1754_v24 = vpack.c.bf16 %v1081_v22, %v1081_v22  ;;  %v1786_v25 = vpack.c.bf16 %v1113_v23, %v1113_v23 }
 0x1ec   : > { %v905_v26 = vpop.f32.mrb[52].mxu0  ;;  %v1033_v27 = vpop.f32.mrb[52].mxu1 }
 0x1ed   : > { %1402 = vst.msk [vmem:[%s2531_s22 + $0x64] sm:$0xf] %vm1376_vm0, %v1754_v24  ;;  %1434 = vst.msk [vmem:[%s2531_s22 + $0xe4] sm:$0xf] %vm1376_vm0, %v1786_v25  ;;  %v906_v28 = vadd.f32 %v2524_v17, %v905_v26  ;;  %v1034_v29 = vadd.f32 %v2524_v17, %v1033_v27  ;;  %v907_v30 = vpop.f32.mrb[53].mxu0  ;;  %v1035_v31 = vpop.f32.mrb[53].mxu1 }
 0x1ee   : > { %v908_v32 = vpop.f32.mrb[54].mxu0  ;;  %v1036_v33 = vpop.f32.mrb[54].mxu1 }
 0x1ef   : > { %v1082_v34 = vmax.f32 %v906_v28, 0.0  ;;  %v1114_v35 = vmax.f32 %v1034_v29, 0.0  ;;  %v909_v36 = vadd.f32 %v2524_v17, %v908_v32  ;;  %v1037_v37 = vadd.f32 %v2524_v17, %v1036_v33  ;;  %v910_v38 = vpop.f32.mrb[55].mxu0  ;;  %v1038_v39 = vpop.f32.mrb[55].mxu1 }
 0x1f1   : > { %v1755_v40 = vpack.c.bf16 %v1082_v34, %v1082_v34  ;;  %v1787_v41 = vpack.c.bf16 %v1114_v35, %v1114_v35  ;;  %v1083_v42 = vmax.f32 %v909_v36, 0.0  ;;  %v1115_v43 = vmax.f32 %v1037_v37, 0.0 }
 0x1f3   : > { %1403 = vst.msk [vmem:[%s2531_s22 + $0x68] sm:$0xf] %vm1376_vm0, %v1755_v40  ;;  %1435 = vst.msk [vmem:[%s2531_s22 + $0xe8] sm:$0xf] %vm1376_vm0, %v1787_v41  ;;  %v1756_v44 = vpack.c.bf16 %v1083_v42, %v1083_v42  ;;  %v1788_v45 = vpack.c.bf16 %v1115_v43, %v1115_v43 }
 0x1f4   : > { %v913_v46 = vpop.f32.mrb[56].mxu0  ;;  %v1041_v47 = vpop.f32.mrb[56].mxu1 }
 0x1f5   : > { %1404 = vst.msk [vmem:[%s2531_s22 + $0x6c] sm:$0xf] %vm1376_vm0, %v1756_v44  ;;  %1436 = vst.msk [vmem:[%s2531_s22 + $0xec] sm:$0xf] %vm1376_vm0, %v1788_v45  ;;  %v914_v48 = vadd.f32 %v2524_v17, %v913_v46  ;;  %v1042_v49 = vadd.f32 %v2524_v17, %v1041_v47  ;;  %v915_v50 = vpop.f32.mrb[57].mxu0  ;;  %v1043_v51 = vpop.f32.mrb[57].mxu1 }
 0x1f6   : > { %v916_v52 = vpop.f32.mrb[58].mxu0  ;;  %v1044_v53 = vpop.f32.mrb[58].mxu1 }
 0x1f7   : > { %v1084_v54 = vmax.f32 %v914_v48, 0.0  ;;  %v1116_v55 = vmax.f32 %v1042_v49, 0.0  ;;  %v917_v56 = vadd.f32 %v2524_v17, %v916_v52  ;;  %v1045_v57 = vadd.f32 %v2524_v17, %v1044_v53  ;;  %v918_v58 = vpop.f32.mrb[59].mxu0  ;;  %v1046_v59 = vpop.f32.mrb[59].mxu1 }
 0x1f9   : > { %v1757_v60 = vpack.c.bf16 %v1084_v54, %v1084_v54  ;;  %v1789_v61 = vpack.c.bf16 %v1116_v55, %v1116_v55  ;;  %v1085_v62 = vmax.f32 %v917_v56, 0.0  ;;  %v1117_v63 = vmax.f32 %v1045_v57, 0.0 }
 0x1fb   : > { %1405 = vst.msk [vmem:[%s2531_s22 + $0x70] sm:$0xf] %vm1376_vm0, %v1757_v60  ;;  %1437 = vst.msk [vmem:[%s2531_s22 + $0xf0] sm:$0xf] %vm1376_vm0, %v1789_v61  ;;  %v1758_v0 = vpack.c.bf16 %v1085_v62, %v1085_v62  ;;  %v1790_v1 = vpack.c.bf16 %v1117_v63, %v1117_v63 }
 0x1fc   : > { %v921_v2 = vpop.f32.mrb[60].mxu0  ;;  %v1049_v3 = vpop.f32.mrb[60].mxu1 }
 0x1fd   : > { %1406 = vst.msk [vmem:[%s2531_s22 + $0x74] sm:$0xf] %vm1376_vm0, %v1758_v0  ;;  %1438 = vst.msk [vmem:[%s2531_s22 + $0xf4] sm:$0xf] %vm1376_vm0, %v1790_v1  ;;  %v922_v4 = vadd.f32 %v2524_v17, %v921_v2  ;;  %v1050_v5 = vadd.f32 %v2524_v17, %v1049_v3  ;;  %v923_v6 = vpop.f32.mrb[61].mxu0  ;;  %v1051_v7 = vpop.f32.mrb[61].mxu1 }
 0x1fe   : > { %v924_v8 = vpop.f32.mrb[62].mxu0  ;;  %v1052_v9 = vpop.f32.mrb[62].mxu1 }
 0x1ff   : > { %v1086_v10 = vmax.f32 %v922_v4, 0.0  ;;  %v1118_v11 = vmax.f32 %v1050_v5, 0.0  ;;  %v925_v12 = vadd.f32 %v2524_v17, %v924_v8  ;;  %v1053_v13 = vadd.f32 %v2524_v17, %v1052_v9  ;;  %v926_v14 = vpop.f32.mrb[63].mxu0  ;;  %v1054_v15 = vpop.f32.mrb[63].mxu1 }
 0x201   : > { %v1759_v16 = vpack.c.bf16 %v1086_v10, %v1086_v10  ;;  %v1791_v18 = vpack.c.bf16 %v1118_v11, %v1118_v11  ;;  %v1087_v19 = vmax.f32 %v925_v12, 0.0  ;;  %v1119_v20 = vmax.f32 %v1053_v13, 0.0 }
 0x203   : > { %1407 = vst.msk [vmem:[%s2531_s22 + $0x78] sm:$0xf] %vm1376_vm0, %v1759_v16  ;;  %1439 = vst.msk [vmem:[%s2531_s22 + $0xf8] sm:$0xf] %vm1376_vm0, %v1791_v18  ;;  %v1760_v17 = vpack.c.bf16 %v1087_v19, %v1087_v19  ;;  %v1792_v21 = vpack.c.bf16 %v1119_v20, %v1119_v20 }
 0x205   : > { %1408 = vst.msk [vmem:[%s2531_s22 + $0x7c] sm:$0xf] %vm1376_vm0, %v1760_v17  ;;  %1440 = vst.msk [vmem:[%s2531_s22 + $0xfc] sm:$0xf] %vm1376_vm0, %v1792_v21 }
 0x206   : > { %2127 = shalt.err (!%p2124_p5)
}
 0x207   : > { %s2128_s10 = scalar_lea.hbm %s2718_s9, 4096  ;;  %s2132_s29 = scalar_lea.hbm %s2779_s3, 16384 }
 0x208   : > { %p2129_p9 = scmp.ne.s32.totalorder %s2718_s9, %s2128_s10  ;;  %p2133_p3 = scmp.lt.u32.totalorder %s2718_s9, %s2779_s3 }
 0x209   : > { %p2134_p7 = scmp.lt.u32.totalorder %s2132_s29, %s2128_s10  ;;  %p2136_p1 = scmp.lt.u32.totalorder %s2128_s10, %s2718_s9 }
 0x20a   : > { %p2130_p12 = pnand %p2129_p9, %p2359_p8 }
 0x20b   : > { %p2135_p10 = por %p2134_p7, %p2133_p3 }
 0x20c   : > { %p2131_p11 = pneg %p2130_p12 }
 0x20d   : > { %p2137_p2 = por %p2136_p1, %p2135_p10 }
 0x20f   : > { %p2138_p4 = pnand %p2137_p2, %p2131_p11 }
 0x211   : > { %2141 = shalt.err (!%p2138_p4)
}
 0x212   : > { %s2211_s22 = smov 64   ;;  %s2212_s24 = smov 4  }
 0x213   : > { %1836 = dma.vmem_to_hbm [thread:$0]  (%p2359_p8), %s2720_s7, 4096, %s2718_s9, %s1442_s15, %s2211_s22, %s2211_s22, %s2212_s24  }
 0x214 PF: > { %p1858_p6 = scmp.ge.s32.totalorder %s2200_s17, 2  ;;  %s1471_s8 = sand.u32 1, %s2180_s12  }
 0x215   : > { %p2796_p13 = scmp.ne.s32.totalorder %s2787_s23, 0  ;;  %s1472_s26 = scalar_lea.sflag [#allocation4], %s1471_s8 }
 0x217   : > { %p1850_p0 = pnand %p1858_p6, %p2796_p13 }
 0x219   : > { %2175 = dma.done.wait (!%p1850_p0), %s1472_s26, 4096  }
 0x21a   : > { %2177 = vsyncadd (!%p1850_p0), %s1472_s26, 4294963200  ;;  %s20_s17 = sadd.s32 1, %s2200_s17   ;;  %s2797_s12 = smov %s2184_s13 }
 0x21b   : > { %p17_p5 = scmp.ge.s32.totalorder %s20_s17, 6   ;;  %s2798_s13 = smov %s2188_s14 }
 0x21c   : > { %s2799_s14 = smov %s2368_s4  ;;  %s2800_s15 = smov %s2196_s16 }
 0x21d   : > { %s2801_s16 = smov %s2803_s18  ;;  %19 = sbr.rel (!%p17_p5) target bundleno = 7 (0x7), region = 87 }
 0x224   :  { %1477 = vsyncpa [#allocation3], 1 }
 0x225   :  { %1479 = vsyncpa [#allocation3 + $0x1], 1 }
 0x226   :  { %1480 = vsyncpa [#allocation6], 1 }
 0x227   :  { %1481 = vsyncpa [#allocation4], 1 }
 0x228   :  { %1483 = vsyncpa [#allocation4 + $0x1], 1 }

</bundles_post_ra>
